<compile_context>
chip_gen: v6e
topology: v6e:2x2x1
jax: 0.10.0
libtpu: 0.0.40
codegen_flags: <defaults>
</compile_context>

<pallas_src>
import functools

import jax
import jax.numpy as jnp
from jax.experimental import pallas as pl
from jax.experimental.pallas import tpu as pltpu

EPS = 1e-5


def transformer_block_kernel(x_ref, bns_ref, bnw_ref, wqkv_ref, wo_ref,
                             w0_ref, w1_ref, out_ref,
                             *, batch, seq, spad, heads, head_dim):
    emb = heads * head_dim
    n = batch * spad
    inv_n = 1.0 / float(batch * seq)            # BN stats over the valid (batch*seq) rows

    # valid-row mask: 1.0 for the `seq` real rows of each batch slab, 0.0 for pad rows.
    row = jax.lax.broadcasted_iota(jnp.int32, (n, 1), 0)
    valid = ((row % spad) < seq).astype(jnp.float32)          # (n, 1), built once

    def masked_bn(h, gamma, beta):
        # BatchNorm1d training-mode forward: per-channel stats over valid rows only,
        # biased variance, single pass; applied as a precomputed scale/shift.
        hm = h * valid
        mean = jnp.sum(hm, axis=0, keepdims=True) * inv_n
        mean_sq = jnp.sum(hm * h, axis=0, keepdims=True) * inv_n
        var = mean_sq - mean * mean
        a = gamma * jax.lax.rsqrt(var + EPS)                  # (1, C)
        b = beta - mean * a                                   # (1, C)
        return h * a + b

    bns = bns_ref[...]                                        # (8, C): a_g,a_b,0_g,0_b,bo,0,0,0
    bnw = bnw_ref[...]                                        # (2, 2C): 1_g, 1_b
    wo = wo_ref[...]                                          # (C, C) bf16
    x = x_ref[...]                                            # (n, C) f32

    # ---------------- self-attention ----------------
    xn = masked_bn(x, bns[0:1, :], bns[1:2, :])
    qkv = jnp.dot(xn.astype(jnp.bfloat16), wqkv_ref[...],
                  preferred_element_type=jnp.float32)         # (n, 3C); 1/sqrt(hd) in Wq

    kpos = jax.lax.broadcasted_iota(jnp.int32, (1, 1, spad), 2)
    key_ok = kpos < seq                                       # mask padded key position

    contribs = []
    for h in range(heads):                                    # static, tiny (heads=2)
        c0 = h * head_dim
        qh = qkv[:, c0:c0 + head_dim].reshape(batch, spad, head_dim)
        kh = qkv[:, emb + c0:emb + c0 + head_dim].reshape(batch, spad, head_dim)
        vh = qkv[:, 2 * emb + c0:2 * emb + c0 + head_dim].reshape(batch, spad, head_dim)
        e = jnp.einsum('bqd,bkd->bqk', qh, kh,
                       preferred_element_type=jnp.float32)    # (batch, spad, spad)
        e = jnp.where(key_ok, e, -1e30)
        e = e - jnp.max(e, axis=-1, keepdims=True)
        p = jnp.exp(e)
        attn = p * pl.reciprocal(jnp.sum(p, axis=-1, keepdims=True), approx=True)
        ctx = jnp.einsum('bqk,bkd->bqd', attn, vh,
                         preferred_element_type=jnp.float32).reshape(n, head_dim)
        # out-projection accumulated per head (no lane concat): Wo rows for head h.
        contribs.append(jnp.dot(ctx.astype(jnp.bfloat16), wo[c0:c0 + head_dim, :],
                                preferred_element_type=jnp.float32))
    attn_out = contribs[0]
    for c in contribs[1:]:
        attn_out = attn_out + c
    attn_out = attn_out + bns[4:5, :]                         # out-projection bias
    res = attn_out + x                                        # attention residual

    # -------------- feed-forward: BN -> ReLU -> linear -> BN -> ReLU -> linear --------
    y = masked_bn(res, bns[2:3, :], bns[3:4, :])
    y = jnp.maximum(y, 0.0)
    y = jnp.dot(y.astype(jnp.bfloat16), w0_ref[...], preferred_element_type=jnp.float32)
    y = masked_bn(y, bnw[0:1, :], bnw[1:2, :])
    y = jnp.maximum(y, 0.0)
    y = jnp.dot(y.astype(jnp.bfloat16), w1_ref[...], preferred_element_type=jnp.float32)

    out_ref[...] = res + y                                    # dropout(p=0.0) == identity


def transformer_forward(x, params, *, num_heads):
    """x: (B, S, C) f32 -> (B, S, C) f32, matching Transformer.forward semantics."""
    B, S, C = x.shape
    assert C % num_heads == 0
    head_dim = C // num_heads
    spad = ((S + 7) // 8) * 8                 # sublane-aligned sequence (31 -> 32)

    # Lane-dense, sublane-aligned activation slab (layout plumbing in the wrapper).
    xp = jnp.pad(x, ((0, 0), (0, spad - S), (0, 0))).reshape(B * spad, C)

    kern = functools.partial(transformer_block_kernel, batch=B, seq=S, spad=spad,
                             heads=num_heads, head_dim=head_dim)

    vmem = pl.BlockSpec(memory_space=pltpu.MemorySpace.VMEM)   # whole-array VMEM blocks
    out_flat = pl.pallas_call(
        kern,
        out_shape=jax.ShapeDtypeStruct((B * spad, C), jnp.float32),
        in_specs=[vmem] * 7,
        out_specs=vmem,
    )(xp, params["bn_small"], params["bn_wide"], params["wqkv"],
      params["wo"], params["w0"], params["w1"])

    return out_flat.reshape(B, spad, C)[:, :S, :]


# ------------------------------------------------------------ param setup ----

def init_params(key, in_dim, num_heads):
    C = in_dim
    head_dim = C // num_heads
    scale = 1.0 / (head_dim ** 0.5)
    keys = iter(jax.random.split(key, 16))

    def nrm(shape, s=0.05):
        return s * jax.random.normal(next(keys), shape, dtype=jnp.float32)

    def bn_pair(dim):
        g = 1.0 + 0.1 * jax.random.normal(next(keys), (dim,), dtype=jnp.float32)
        b = 0.1 * jax.random.normal(next(keys), (dim,), dtype=jnp.float32)
        return g, b

    bn_a_g, bn_a_b = bn_pair(C)        # SelfAttention.norm
    bn0_g, bn0_b = bn_pair(C)          # Transformer.norm_0
    bn1_g, bn1_b = bn_pair(2 * C)      # Transformer.norm_1

    wq = nrm((C, C)) * scale           # stored (in, out) == torch W.T; scale folded in
    wk = nrm((C, C))
    wv = nrm((C, C))
    wo = nrm((C, C))
    bo = nrm((C,))
    w0 = nrm((C, 2 * C))
    w1 = nrm((2 * C, C))

    bn_small = jnp.concatenate(
        [jnp.stack([bn_a_g, bn_a_b, bn0_g, bn0_b, bo]),
         jnp.zeros((3, C), jnp.float32)], axis=0)             # (8, C)

    return {
        "bn_small": bn_small,                                   # (8, C)   f32
        "bn_wide": jnp.stack([bn1_g, bn1_b]),                   # (2, 2C)  f32
        "wqkv": jnp.concatenate([wq, wk, wv], axis=1).astype(jnp.bfloat16),  # (C, 3C)
        "wo": wo.astype(jnp.bfloat16),                          # (C, C)
        "w0": w0.astype(jnp.bfloat16),                          # (C, 2C)
        "w1": w1.astype(jnp.bfloat16),                          # (2C, C)
    }


if __name__ == "__main__":
    # Module-consistent small shapes: in_dim=128, num_heads=2,
    # seq_len = num_particles + 1 = 31, batch = 2.
    B, S, C, HEADS = 2, 31, 128, 2

    key = jax.random.PRNGKey(0)
    k_x, k_p = jax.random.split(key)
    x = jax.random.normal(k_x, (B, S, C), dtype=jnp.float32)
    params = init_params(k_p, C, HEADS)

    out = transformer_forward(x, params, num_heads=HEADS)
    out = jax.block_until_ready(out)

    assert out.shape == (B, S, C), out.shape
    assert bool(jnp.all(jnp.isfinite(out))), "non-finite output"
    print("KERNEL_OK")
</pallas_src>

<mosaic_0001>
module attributes {stable_mosaic.version = 11 : i64} {
  func.func @transformer_block_kernel(%arg0: memref<64x128xf32, #tpu.memory_space<vmem>>, %arg1: memref<8x128xf32, #tpu.memory_space<vmem>>, %arg2: memref<2x256xf32, #tpu.memory_space<vmem>>, %arg3: memref<128x384xbf16, #tpu.memory_space<vmem>>, %arg4: memref<128x128xbf16, #tpu.memory_space<vmem>>, %arg5: memref<128x256xbf16, #tpu.memory_space<vmem>>, %arg6: memref<256x128xbf16, #tpu.memory_space<vmem>>, %arg7: memref<64x128xf32, #tpu.memory_space<vmem>>) attributes {dimension_semantics = [], scalar_prefetch = 0 : i64, scratch_operands = 0 : i64, tpu.core_type = #tpu.core_type<tc>} {
    %0 = tpu.iota {dimensions = array<i32: 0>} : vector<64x1xi32>
    %c32_i32 = arith.constant 32 : i32
    %c0_i32 = arith.constant 0 : i32
    %1 = arith.cmpi eq, %c32_i32, %c0_i32 : i32
    %c1_i32 = arith.constant 1 : i32
    %2 = arith.select %1, %c1_i32, %c32_i32 : i32
    %3 = vector.broadcast %2 : i32 to vector<64x1xi32>
    %4 = arith.remsi %0, %3 : vector<64x1xi32>
    %c0_i32_0 = arith.constant 0 : i32
    %5 = vector.broadcast %c0_i32_0 : i32 to vector<64x1xi32>
    %6 = arith.cmpi ne, %4, %5 : vector<64x1xi32>
    %c0_i32_1 = arith.constant 0 : i32
    %7 = vector.broadcast %c0_i32_1 : i32 to vector<64x1xi32>
    %8 = arith.cmpi slt, %4, %7 : vector<64x1xi32>
    %c0_i32_2 = arith.constant 0 : i32
    %9 = arith.cmpi slt, %2, %c0_i32_2 : i32
    %10 = vector.broadcast %9 : i1 to vector<64x1xi1>
    %11 = vector.broadcast %10 : vector<64x1xi1> to vector<64x1xi1>
    %12 = arith.xori %8, %11 : vector<64x1xi1>
    %13 = arith.andi %12, %6 : vector<64x1xi1>
    %14 = vector.broadcast %2 : i32 to vector<64x1xi32>
    %15 = arith.addi %4, %14 : vector<64x1xi32>
    %16 = arith.select %13, %15, %4 : vector<64x1xi1>, vector<64x1xi32>
    %c31_i32 = arith.constant 31 : i32
    %17 = vector.broadcast %c31_i32 : i32 to vector<64x1xi32>
    %18 = arith.cmpi slt, %16, %17 : vector<64x1xi32>
    %19 = arith.extui %18 : vector<64x1xi1> to vector<64x1xi32>
    %20 = arith.sitofp %19 : vector<64x1xi32> to vector<64x1xf32>
    %c0 = arith.constant 0 : index
    %c0_3 = arith.constant 0 : index
    %21 = vector.load %arg1[%c0, %c0_3] : memref<8x128xf32, #tpu.memory_space<vmem>>, vector<8x128xf32>
    %c0_4 = arith.constant 0 : index
    %c0_5 = arith.constant 0 : index
    %22 = vector.load %arg2[%c0_4, %c0_5] : memref<2x256xf32, #tpu.memory_space<vmem>>, vector<2x256xf32>
    %c0_6 = arith.constant 0 : index
    %c0_7 = arith.constant 0 : index
    %23 = vector.load %arg4[%c0_6, %c0_7] : memref<128x128xbf16, #tpu.memory_space<vmem>>, vector<128x128xbf16>
    %c0_8 = arith.constant 0 : index
    %c0_9 = arith.constant 0 : index
    %24 = vector.load %arg0[%c0_8, %c0_9] : memref<64x128xf32, #tpu.memory_space<vmem>>, vector<64x128xf32>
    %25 = vector.extract_strided_slice %21 {offsets = [0, 0], sizes = [1, 128], strides = [1, 1]} : vector<8x128xf32> to vector<1x128xf32>
    %26 = vector.extract_strided_slice %21 {offsets = [1, 0], sizes = [1, 128], strides = [1, 1]} : vector<8x128xf32> to vector<1x128xf32>
    %27 = vector.broadcast %20 : vector<64x1xf32> to vector<64x128xf32>
    %28 = arith.mulf %24, %27 : vector<64x128xf32>
    %cst = arith.constant dense<0.000000e+00> : vector<128xf32>
    %29 = vector.multi_reduction <add>, %28, %cst [0] : vector<64x128xf32> to vector<128xf32>
    %30 = vector.shape_cast %29 : vector<128xf32> to vector<1x128xf32>
    %cst_10 = arith.constant 0.0161290318 : f32
    %31 = vector.broadcast %cst_10 : f32 to vector<1x128xf32>
    %32 = arith.mulf %30, %31 : vector<1x128xf32>
    %33 = arith.mulf %28, %24 : vector<64x128xf32>
    %cst_11 = arith.constant dense<0.000000e+00> : vector<128xf32>
    %34 = vector.multi_reduction <add>, %33, %cst_11 [0] : vector<64x128xf32> to vector<128xf32>
    %35 = vector.shape_cast %34 : vector<128xf32> to vector<1x128xf32>
    %cst_12 = arith.constant 0.0161290318 : f32
    %36 = vector.broadcast %cst_12 : f32 to vector<1x128xf32>
    %37 = arith.mulf %35, %36 : vector<1x128xf32>
    %38 = arith.mulf %32, %32 : vector<1x128xf32>
    %39 = arith.subf %37, %38 : vector<1x128xf32>
    %cst_13 = arith.constant 9.99999974E-6 : f32
    %40 = vector.broadcast %cst_13 : f32 to vector<1x128xf32>
    %41 = arith.addf %39, %40 : vector<1x128xf32>
    %42 = math.rsqrt %41 : vector<1x128xf32>
    %43 = arith.mulf %25, %42 : vector<1x128xf32>
    %44 = arith.mulf %32, %43 : vector<1x128xf32>
    %45 = arith.subf %26, %44 : vector<1x128xf32>
    %46 = vector.broadcast %43 : vector<1x128xf32> to vector<64x128xf32>
    %47 = arith.mulf %24, %46 : vector<64x128xf32>
    %48 = vector.broadcast %45 : vector<1x128xf32> to vector<64x128xf32>
    %49 = arith.addf %47, %48 : vector<64x128xf32>
    %50 = arith.truncf %49 : vector<64x128xf32> to vector<64x128xbf16>
    %c0_14 = arith.constant 0 : index
    %c0_15 = arith.constant 0 : index
    %51 = vector.load %arg3[%c0_14, %c0_15] : memref<128x384xbf16, #tpu.memory_space<vmem>>, vector<128x384xbf16>
    %cst_16 = arith.constant dense<0.000000e+00> : vector<64x384xf32>
    %52 = tpu.matmul %50, %51, %cst_16 {dimension_numbers = #tpu.dot_dimension_numbers<[1], [0], [0], [1], [0, 0, 1, 1], [], []>} : vector<64x128xbf16>, vector<128x384xbf16>, vector<64x384xf32> -> vector<64x384xf32>
    %53 = tpu.iota {dimensions = array<i32: 2>} : vector<1x1x32xi32>
    %c31_i32_17 = arith.constant 31 : i32
    %54 = vector.broadcast %c31_i32_17 : i32 to vector<1x1x32xi32>
    %55 = arith.cmpi slt, %53, %54 : vector<1x1x32xi32>
    %56 = vector.extract_strided_slice %52 {offsets = [0, 0], sizes = [64, 64], strides = [1, 1]} : vector<64x384xf32> to vector<64x64xf32>
    %57 = vector.shape_cast %56 : vector<64x64xf32> to vector<2x32x64xf32>
    %58 = vector.extract_strided_slice %52 {offsets = [0, 128], sizes = [64, 64], strides = [1, 1]} : vector<64x384xf32> to vector<64x64xf32>
    %59 = vector.shape_cast %58 : vector<64x64xf32> to vector<2x32x64xf32>
    %60 = vector.extract_strided_slice %52 {offsets = [0, 256], sizes = [64, 64], strides = [1, 1]} : vector<64x384xf32> to vector<64x64xf32>
    %61 = vector.shape_cast %60 : vector<64x64xf32> to vector<2x32x64xf32>
    "tpu.trace_start"() <{level = 10 : i32, message = "bqd,bkd->bqk"}> : () -> ()
    %cst_18 = arith.constant dense<0.000000e+00> : vector<2x32x32xf32>
    %62 = tpu.matmul %57, %59, %cst_18 {dimension_numbers = #tpu.dot_dimension_numbers<[2], [2], [1], [1], [0, 0, 0, 1, 1, 1], [0], [0]>} : vector<2x32x64xf32>, vector<2x32x64xf32>, vector<2x32x32xf32> -> vector<2x32x32xf32>
    %cst_19 = arith.constant -1.000000e+30 : f32
    "tpu.trace_stop"() : () -> ()
    %63 = vector.shape_cast %55 : vector<1x1x32xi1> to vector<1x1x32xi1>
    %64 = vector.broadcast %63 : vector<1x1x32xi1> to vector<2x32x32xi1>
    %65 = vector.broadcast %cst_19 : f32 to vector<2x32x32xf32>
    %66 = arith.select %64, %62, %65 : vector<2x32x32xi1>, vector<2x32x32xf32>
    %cst_20 = arith.constant dense<0xFF800000> : vector<2x32xf32>
    %67 = vector.multi_reduction <maximumf>, %66, %cst_20 [2] : vector<2x32x32xf32> to vector<2x32xf32>
    %68 = vector.shape_cast %67 : vector<2x32xf32> to vector<2x32x1xf32>
    %69 = vector.broadcast %68 : vector<2x32x1xf32> to vector<2x32x32xf32>
    %70 = arith.subf %66, %69 : vector<2x32x32xf32>
    %71 = math.exp %70 : vector<2x32x32xf32>
    %cst_21 = arith.constant dense<0.000000e+00> : vector<2x32xf32>
    %72 = vector.multi_reduction <add>, %71, %cst_21 [2] : vector<2x32x32xf32> to vector<2x32xf32>
    %73 = vector.shape_cast %72 : vector<2x32xf32> to vector<2x32x1xf32>
    %74 = tpu.reciprocal %73 {approx = true} : vector<2x32x1xf32> -> vector<2x32x1xf32>
    %75 = vector.broadcast %74 : vector<2x32x1xf32> to vector<2x32x32xf32>
    %76 = arith.mulf %71, %75 : vector<2x32x32xf32>
    "tpu.trace_start"() <{level = 10 : i32, message = "bqk,bkd->bqd"}> : () -> ()
    %cst_22 = arith.constant dense<0.000000e+00> : vector<2x32x64xf32>
    %77 = tpu.matmul %76, %61, %cst_22 {dimension_numbers = #tpu.dot_dimension_numbers<[2], [1], [1], [2], [0, 0, 0, 1, 1, 2], [0], [0]>} : vector<2x32x32xf32>, vector<2x32x64xf32>, vector<2x32x64xf32> -> vector<2x32x64xf32>
    "tpu.trace_stop"() : () -> ()
    %78 = vector.shape_cast %77 : vector<2x32x64xf32> to vector<64x64xf32>
    %79 = arith.truncf %78 : vector<64x64xf32> to vector<64x64xbf16>
    %80 = vector.extract_strided_slice %23 {offsets = [0, 0], sizes = [64, 128], strides = [1, 1]} : vector<128x128xbf16> to vector<64x128xbf16>
    %cst_23 = arith.constant dense<0.000000e+00> : vector<64x128xf32>
    %81 = tpu.matmul %79, %80, %cst_23 {dimension_numbers = #tpu.dot_dimension_numbers<[1], [0], [0], [1], [0, 0, 1, 1], [], []>} : vector<64x64xbf16>, vector<64x128xbf16>, vector<64x128xf32> -> vector<64x128xf32>
    %82 = vector.extract_strided_slice %52 {offsets = [0, 64], sizes = [64, 64], strides = [1, 1]} : vector<64x384xf32> to vector<64x64xf32>
    %83 = vector.shape_cast %82 : vector<64x64xf32> to vector<2x32x64xf32>
    %84 = vector.extract_strided_slice %52 {offsets = [0, 192], sizes = [64, 64], strides = [1, 1]} : vector<64x384xf32> to vector<64x64xf32>
    %85 = vector.shape_cast %84 : vector<64x64xf32> to vector<2x32x64xf32>
    %86 = vector.extract_strided_slice %52 {offsets = [0, 320], sizes = [64, 64], strides = [1, 1]} : vector<64x384xf32> to vector<64x64xf32>
    %87 = vector.shape_cast %86 : vector<64x64xf32> to vector<2x32x64xf32>
    "tpu.trace_start"() <{level = 10 : i32, message = "bqd,bkd->bqk"}> : () -> ()
    %cst_24 = arith.constant dense<0.000000e+00> : vector<2x32x32xf32>
    %88 = tpu.matmul %83, %85, %cst_24 {dimension_numbers = #tpu.dot_dimension_numbers<[2], [2], [1], [1], [0, 0, 0, 1, 1, 1], [0], [0]>} : vector<2x32x64xf32>, vector<2x32x64xf32>, vector<2x32x32xf32> -> vector<2x32x32xf32>
    %cst_25 = arith.constant -1.000000e+30 : f32
    "tpu.trace_stop"() : () -> ()
    %89 = vector.shape_cast %55 : vector<1x1x32xi1> to vector<1x1x32xi1>
    %90 = vector.broadcast %89 : vector<1x1x32xi1> to vector<2x32x32xi1>
    %91 = vector.broadcast %cst_25 : f32 to vector<2x32x32xf32>
    %92 = arith.select %90, %88, %91 : vector<2x32x32xi1>, vector<2x32x32xf32>
    %cst_26 = arith.constant dense<0xFF800000> : vector<2x32xf32>
    %93 = vector.multi_reduction <maximumf>, %92, %cst_26 [2] : vector<2x32x32xf32> to vector<2x32xf32>
    %94 = vector.shape_cast %93 : vector<2x32xf32> to vector<2x32x1xf32>
    %95 = vector.broadcast %94 : vector<2x32x1xf32> to vector<2x32x32xf32>
    %96 = arith.subf %92, %95 : vector<2x32x32xf32>
    %97 = math.exp %96 : vector<2x32x32xf32>
    %cst_27 = arith.constant dense<0.000000e+00> : vector<2x32xf32>
    %98 = vector.multi_reduction <add>, %97, %cst_27 [2] : vector<2x32x32xf32> to vector<2x32xf32>
    %99 = vector.shape_cast %98 : vector<2x32xf32> to vector<2x32x1xf32>
    %100 = tpu.reciprocal %99 {approx = true} : vector<2x32x1xf32> -> vector<2x32x1xf32>
    %101 = vector.broadcast %100 : vector<2x32x1xf32> to vector<2x32x32xf32>
    %102 = arith.mulf %97, %101 : vector<2x32x32xf32>
    "tpu.trace_start"() <{level = 10 : i32, message = "bqk,bkd->bqd"}> : () -> ()
    %cst_28 = arith.constant dense<0.000000e+00> : vector<2x32x64xf32>
    %103 = tpu.matmul %102, %87, %cst_28 {dimension_numbers = #tpu.dot_dimension_numbers<[2], [1], [1], [2], [0, 0, 0, 1, 1, 2], [0], [0]>} : vector<2x32x32xf32>, vector<2x32x64xf32>, vector<2x32x64xf32> -> vector<2x32x64xf32>
    "tpu.trace_stop"() : () -> ()
    %104 = vector.shape_cast %103 : vector<2x32x64xf32> to vector<64x64xf32>
    %105 = arith.truncf %104 : vector<64x64xf32> to vector<64x64xbf16>
    %106 = vector.extract_strided_slice %23 {offsets = [64, 0], sizes = [64, 128], strides = [1, 1]} : vector<128x128xbf16> to vector<64x128xbf16>
    %cst_29 = arith.constant dense<0.000000e+00> : vector<64x128xf32>
    %107 = tpu.matmul %105, %106, %cst_29 {dimension_numbers = #tpu.dot_dimension_numbers<[1], [0], [0], [1], [0, 0, 1, 1], [], []>} : vector<64x64xbf16>, vector<64x128xbf16>, vector<64x128xf32> -> vector<64x128xf32>
    %108 = arith.addf %81, %107 : vector<64x128xf32>
    %109 = vector.extract_strided_slice %21 {offsets = [4, 0], sizes = [1, 128], strides = [1, 1]} : vector<8x128xf32> to vector<1x128xf32>
    %110 = vector.broadcast %109 : vector<1x128xf32> to vector<64x128xf32>
    %111 = arith.addf %108, %110 : vector<64x128xf32>
    %112 = arith.addf %111, %24 : vector<64x128xf32>
    %113 = vector.extract_strided_slice %21 {offsets = [2, 0], sizes = [1, 128], strides = [1, 1]} : vector<8x128xf32> to vector<1x128xf32>
    %114 = vector.extract_strided_slice %21 {offsets = [3, 0], sizes = [1, 128], strides = [1, 1]} : vector<8x128xf32> to vector<1x128xf32>
    %115 = vector.broadcast %20 : vector<64x1xf32> to vector<64x128xf32>
    %116 = arith.mulf %112, %115 : vector<64x128xf32>
    %cst_30 = arith.constant dense<0.000000e+00> : vector<128xf32>
    %117 = vector.multi_reduction <add>, %116, %cst_30 [0] : vector<64x128xf32> to vector<128xf32>
    %118 = vector.shape_cast %117 : vector<128xf32> to vector<1x128xf32>
    %cst_31 = arith.constant 0.0161290318 : f32
    %119 = vector.broadcast %cst_31 : f32 to vector<1x128xf32>
    %120 = arith.mulf %118, %119 : vector<1x128xf32>
    %121 = arith.mulf %116, %112 : vector<64x128xf32>
    %cst_32 = arith.constant dense<0.000000e+00> : vector<128xf32>
    %122 = vector.multi_reduction <add>, %121, %cst_32 [0] : vector<64x128xf32> to vector<128xf32>
    %123 = vector.shape_cast %122 : vector<128xf32> to vector<1x128xf32>
    %cst_33 = arith.constant 0.0161290318 : f32
    %124 = vector.broadcast %cst_33 : f32 to vector<1x128xf32>
    %125 = arith.mulf %123, %124 : vector<1x128xf32>
    %126 = arith.mulf %120, %120 : vector<1x128xf32>
    %127 = arith.subf %125, %126 : vector<1x128xf32>
    %cst_34 = arith.constant 9.99999974E-6 : f32
    %128 = vector.broadcast %cst_34 : f32 to vector<1x128xf32>
    %129 = arith.addf %127, %128 : vector<1x128xf32>
    %130 = math.rsqrt %129 : vector<1x128xf32>
    %131 = arith.mulf %113, %130 : vector<1x128xf32>
    %132 = arith.mulf %120, %131 : vector<1x128xf32>
    %133 = arith.subf %114, %132 : vector<1x128xf32>
    %134 = vector.broadcast %131 : vector<1x128xf32> to vector<64x128xf32>
    %135 = arith.mulf %112, %134 : vector<64x128xf32>
    %136 = vector.broadcast %133 : vector<1x128xf32> to vector<64x128xf32>
    %137 = arith.addf %135, %136 : vector<64x128xf32>
    %cst_35 = arith.constant 0.000000e+00 : f32
    %138 = vector.broadcast %cst_35 : f32 to vector<64x128xf32>
    %139 = arith.maximumf %137, %138 : vector<64x128xf32>
    %140 = arith.truncf %139 : vector<64x128xf32> to vector<64x128xbf16>
    %c0_36 = arith.constant 0 : index
    %c0_37 = arith.constant 0 : index
    %141 = vector.load %arg5[%c0_36, %c0_37] : memref<128x256xbf16, #tpu.memory_space<vmem>>, vector<128x256xbf16>
    %cst_38 = arith.constant dense<0.000000e+00> : vector<64x256xf32>
    %142 = tpu.matmul %140, %141, %cst_38 {dimension_numbers = #tpu.dot_dimension_numbers<[1], [0], [0], [1], [0, 0, 1, 1], [], []>} : vector<64x128xbf16>, vector<128x256xbf16>, vector<64x256xf32> -> vector<64x256xf32>
    %143 = vector.extract_strided_slice %22 {offsets = [0, 0], sizes = [1, 256], strides = [1, 1]} : vector<2x256xf32> to vector<1x256xf32>
    %144 = vector.extract_strided_slice %22 {offsets = [1, 0], sizes = [1, 256], strides = [1, 1]} : vector<2x256xf32> to vector<1x256xf32>
    %145 = vector.broadcast %20 : vector<64x1xf32> to vector<64x256xf32>
    %146 = arith.mulf %142, %145 : vector<64x256xf32>
    %cst_39 = arith.constant dense<0.000000e+00> : vector<256xf32>
    %147 = vector.multi_reduction <add>, %146, %cst_39 [0] : vector<64x256xf32> to vector<256xf32>
    %148 = vector.shape_cast %147 : vector<256xf32> to vector<1x256xf32>
    %cst_40 = arith.constant 0.0161290318 : f32
    %149 = vector.broadcast %cst_40 : f32 to vector<1x256xf32>
    %150 = arith.mulf %148, %149 : vector<1x256xf32>
    %151 = arith.mulf %146, %142 : vector<64x256xf32>
    %cst_41 = arith.constant dense<0.000000e+00> : vector<256xf32>
    %152 = vector.multi_reduction <add>, %151, %cst_41 [0] : vector<64x256xf32> to vector<256xf32>
    %153 = vector.shape_cast %152 : vector<256xf32> to vector<1x256xf32>
    %cst_42 = arith.constant 0.0161290318 : f32
    %154 = vector.broadcast %cst_42 : f32 to vector<1x256xf32>
    %155 = arith.mulf %153, %154 : vector<1x256xf32>
    %156 = arith.mulf %150, %150 : vector<1x256xf32>
    %157 = arith.subf %155, %156 : vector<1x256xf32>
    %cst_43 = arith.constant 9.99999974E-6 : f32
    %158 = vector.broadcast %cst_43 : f32 to vector<1x256xf32>
    %159 = arith.addf %157, %158 : vector<1x256xf32>
    %160 = math.rsqrt %159 : vector<1x256xf32>
    %161 = arith.mulf %143, %160 : vector<1x256xf32>
    %162 = arith.mulf %150, %161 : vector<1x256xf32>
    %163 = arith.subf %144, %162 : vector<1x256xf32>
    %164 = vector.broadcast %161 : vector<1x256xf32> to vector<64x256xf32>
    %165 = arith.mulf %142, %164 : vector<64x256xf32>
    %166 = vector.broadcast %163 : vector<1x256xf32> to vector<64x256xf32>
    %167 = arith.addf %165, %166 : vector<64x256xf32>
    %cst_44 = arith.constant 0.000000e+00 : f32
    %168 = vector.broadcast %cst_44 : f32 to vector<64x256xf32>
    %169 = arith.maximumf %167, %168 : vector<64x256xf32>
    %170 = arith.truncf %169 : vector<64x256xf32> to vector<64x256xbf16>
    %c0_45 = arith.constant 0 : index
    %c0_46 = arith.constant 0 : index
    %171 = vector.load %arg6[%c0_45, %c0_46] : memref<256x128xbf16, #tpu.memory_space<vmem>>, vector<256x128xbf16>
    %cst_47 = arith.constant dense<0.000000e+00> : vector<64x128xf32>
    %172 = tpu.matmul %170, %171, %cst_47 {dimension_numbers = #tpu.dot_dimension_numbers<[1], [0], [0], [1], [0, 0, 1, 1], [], []>} : vector<64x256xbf16>, vector<256x128xbf16>, vector<64x128xf32> -> vector<64x128xf32>
    %173 = arith.addf %112, %172 : vector<64x128xf32>
    %c0_48 = arith.constant 0 : index
    %c0_49 = arith.constant 0 : index
    %174 = vector.load %arg7[%c0_48, %c0_49] : memref<64x128xf32, #tpu.memory_space<vmem>>, vector<64x128xf32>
    tpu.vector_store %arg7[%c0_48, %c0_49], %173 {strides = array<i32>} : memref<64x128xf32, #tpu.memory_space<vmem>>, vector<64x128xf32>,
    return
  }
}

</mosaic_0001>

<bundles_post_ra>
// kernel: tpu_custom_call.1
= control target key start
LH: loop header
LB: loop body
LE: loop exit
PB: predicated region body
PF: predicated region fallthrough
CT: control target
= control target key end

     0   :  { %12 = vsyncpa [#allocation3], 0  ;;  %s4120_s0 = inlined_call_operand.hbm [shape: f32[64,128], index: 0, kind: input, shape index: {}]   ;;  %s4121_s1 = inlined_call_operand.hbm [shape: f32[8,128], index: 1, kind: input, shape index: {}]   ;;  %s4122_s2 = inlined_call_operand.hbm [shape: f32[2,256], index: 2, kind: input, shape index: {}]   ;;  %s4123_s3 = inlined_call_operand.hbm [shape: bf16[128,384], index: 3, kind: input, shape index: {}]   ;;  %s4124_s4 = inlined_call_operand.hbm [shape: bf16[128,128], index: 4, kind: input, shape index: {}]   ;;  %s4125_s5 = inlined_call_operand.hbm [shape: bf16[128,256], index: 5, kind: input, shape index: {}]   ;;  %s4126_s6 = inlined_call_operand.hbm [shape: bf16[256,128], index: 6, kind: input, shape index: {}]   ;;  %s4127_s7 = inlined_call_operand.hbm [shape: f32[64,128], index: 7, kind: output, shape index: {}]  }
   0x1   :  { %13 = vsyncpa [#allocation6], 0 }
   0x2   :  { %14 = vsyncpa [#allocation9], 0 }
   0x3   :  { %15 = vsyncpa [#allocation12], 0 }
   0x4   :  { %16 = vsyncpa [#allocation4], 0  ;;  %s3430_s24 = smov [#allocation5]   ;;  %s3431_s26 = smov [#allocation8]  }
   0x5   :  { %s35_s25 = sshll.u32 %s3430_s24, 4  ;;  %s54_s27 = sshll.u32 %s3431_s26, 4  ;;  %s36_s25 = int_to_ptr.vmem [resolvable:$true] %s35_s25  ;;  %s55_s27 = int_to_ptr.vmem [resolvable:$true] %s54_s27 }
   0x6   :  { %s3268_s28 = scalar_lea.vmem %s36_s25, 128  ;;  %p3273_p1 = scmp.lt.s32.totalorder %s36_s25, %s36_s25 }
   0x7   :  { %p3269_p0 = scmp.ne.s32.totalorder %s36_s25, %s3268_s28  ;;  %p3274_p2 = scmp.lt.s32.totalorder %s3268_s28, %s3268_s28 }
   0x9   :  { %p3275_p3 = por %p3274_p2, %p3273_p1 }
   0xb   :  { %p3276_p4 = pnand %p3275_p3, %p3269_p0 }
   0xd   :  { %3279 = shalt.err (!%p3276_p4)
}
   0xe   :  { %38 = dma.hbm_to_vmem [thread:$0]  %s4121_s1, 128, %s36_s25, [#allocation6]  }
   0xf   :  { %s3288_s8 = scalar_lea.vmem %s55_s27, 3072  ;;  %p3293_p6 = scmp.lt.s32.totalorder %s55_s27, %s55_s27 }
  0x10   :  { %p3289_p5 = scmp.ne.s32.totalorder %s55_s27, %s3288_s8  ;;  %p3294_p7 = scmp.lt.s32.totalorder %s3288_s8, %s3288_s8 }
  0x12   :  { %p3295_p8 = por %p3294_p7, %p3293_p6 }
  0x14   :  { %p3296_p9 = pnand %p3295_p8, %p3289_p5 }
  0x16   :  { %3299 = shalt.err (!%p3296_p9)
}
  0x17   :  { %s3432_s9 = smov 192   ;;  %s3433_s10 = smov 12  }
  0x18   :  { %60 = dma.hbm_to_vmem [thread:$0]  %s4123_s3, 3072, %s55_s27, [#allocation9], %s3432_s9, %s3432_s9, %s3433_s10  }
  0x19   :  { %s3434_s13 = smov [#allocation11]   ;;  %s3435_s15 = smov [#allocation2]  }
  0x1a   :  { %s78_s14 = sshll.u32 %s3434_s13, 4  ;;  %s22_s16 = sshll.u32 %s3435_s15, 4  ;;  %s79_s14 = int_to_ptr.vmem [resolvable:$true] %s78_s14  ;;  %s23_s16 = int_to_ptr.vmem [resolvable:$true] %s22_s16 }
  0x1b   :  { %s3308_s1 = scalar_lea.vmem %s79_s14, 2048  ;;  %p3313_p11 = scmp.lt.s32.totalorder %s79_s14, %s79_s14 }
  0x1c   :  { %p3309_p10 = scmp.ne.s32.totalorder %s79_s14, %s3308_s1  ;;  %p3314_p12 = scmp.lt.s32.totalorder %s3308_s1, %s3308_s1 }
  0x1e   :  { %p3315_p13 = por %p3314_p12, %p3313_p11 }
  0x20   :  { %p3316_p0 = pnand %p3315_p13, %p3309_p10 }
  0x22   :  { %3319 = shalt.err (!%p3316_p0)
}
  0x23   :  { %s3436_s17 = smov 128   ;;  %s3437_s18 = smov 8  }
  0x24   :  { %84 = dma.hbm_to_vmem [thread:$0]  %s4125_s5, 2048, %s79_s14, [#allocation12], %s3436_s17, %s3436_s17, %s3437_s18  }
  0x25   :  { %s3328_s20 = scalar_lea.vmem %s23_s16, 1024  ;;  %p3333_p2 = scmp.lt.s32.totalorder %s23_s16, %s23_s16 }
  0x26   :  { %p3329_p1 = scmp.ne.s32.totalorder %s23_s16, %s3328_s20  ;;  %p3334_p3 = scmp.lt.s32.totalorder %s3328_s20, %s3328_s20 }
  0x28   :  { %p3335_p4 = por %p3334_p3, %p3333_p2 }
  0x2a   :  { %p3336_p5 = pnand %p3335_p4, %p3329_p1 }
  0x2c   :  { %3339 = shalt.err (!%p3336_p5)
}
  0x2d   :  { %28 = dma.hbm_to_vmem [thread:$0]  %s4120_s0, 1024, %s23_s16, [#allocation3], %s3436_s17, %s3436_s17, %s3437_s18  }
  0x2e   :  { %s3438_s23 = smov [#allocation7]   ;;  %s3439_s25 = smov [#allocation10]  }
  0x2f   :  { %s45_s24 = sshll.u32 %s3438_s23, 4  ;;  %s66_s26 = sshll.u32 %s3439_s25, 4  ;;  %s46_s24 = int_to_ptr.vmem [resolvable:$true] %s45_s24  ;;  %s67_s26 = int_to_ptr.vmem [resolvable:$true] %s66_s26 }
  0x30   :  { %s3348_s5 = scalar_lea.vmem %s46_s24, 64  ;;  %p3353_p7 = scmp.lt.s32.totalorder %s46_s24, %s46_s24 }
  0x31   :  { %p3349_p6 = scmp.ne.s32.totalorder %s46_s24, %s3348_s5  ;;  %p3354_p8 = scmp.lt.s32.totalorder %s3348_s5, %s3348_s5 }
  0x33   :  { %p3355_p9 = por %p3354_p8, %p3353_p7 }
  0x35   :  { %p3356_p10 = pnand %p3355_p9, %p3349_p6 }
  0x37   :  { %3359 = shalt.err (!%p3356_p10)
}
  0x38   :  { %48 = dma.hbm_to_vmem [thread:$0]  %s4122_s2, 64, %s46_s24, [#allocation6]  }
  0x39   :  { %s3368_s29 = scalar_lea.vmem %s67_s26, 1024  ;;  %p3373_p12 = scmp.lt.s32.totalorder %s67_s26, %s67_s26 }
  0x3a   :  { %p3369_p11 = scmp.ne.s32.totalorder %s67_s26, %s3368_s29  ;;  %p3374_p13 = scmp.lt.s32.totalorder %s3368_s29, %s3368_s29 }
  0x3c   :  { %p3375_p0 = por %p3374_p13, %p3373_p12 }
  0x3e   :  { %p3376_p1 = pnand %p3375_p0, %p3369_p11 }
  0x40   :  { %3379 = shalt.err (!%p3376_p1)
}
  0x41   :  { %s3440_s0 = smov 64   ;;  %s3441_s30 = smov 4  }
  0x42   :  { %72 = dma.hbm_to_vmem [thread:$0]  %s4124_s4, 1024, %s67_s26, [#allocation9], %s3440_s0, %s3440_s0, %s3441_s30  }
  0x43   :  { %s3442_s10 = smov [#allocation13]  }
  0x44   :  { %s90_s11 = sshll.u32 %s3442_s10, 4  ;;  %s91_s11 = int_to_ptr.vmem [resolvable:$true] %s90_s11 }
  0x45   :  { %s3388_s12 = scalar_lea.vmem %s91_s11, 2048  ;;  %p3393_p3 = scmp.lt.s32.totalorder %s91_s11, %s91_s11 }
  0x46   :  { %p3389_p2 = scmp.ne.s32.totalorder %s91_s11, %s3388_s12  ;;  %p3394_p4 = scmp.lt.s32.totalorder %s3388_s12, %s3388_s12 }
  0x48   :  { %p3395_p5 = por %p3394_p4, %p3393_p3 }
  0x4a   :  { %p3396_p6 = pnand %p3395_p5, %p3389_p2 }
  0x4c   :  { %3399 = shalt.err (!%p3396_p6)
}
  0x4d   :  { %96 = dma.hbm_to_vmem [thread:$0]  %s4126_s6, 2048, %s91_s11, [#allocation12], %s3440_s0, %s3440_s0, %s3441_s30  }
  0x4e   :  { %3420 = dma.done.wait [#allocation3], 1024  }
  0x4f   :  { %3421 = vsyncadd [#allocation3], 4294966272 }
  0x50   :  { %3422 = dma.done.wait [#allocation6], 192  }
  0x51   :  { %3423 = vsyncadd [#allocation6], 4294967104 }
  0x52   :  { %3424 = dma.done.wait [#allocation9], 4096  }
  0x53   :  { %3425 = vsyncadd [#allocation9], 4294963200 }
  0x54   :  { %3426 = dma.done.wait [#allocation12], 4096  }
  0x55   :  { %3427 = vsyncadd [#allocation12], 4294963200  ;;  %v119_v0 = vlaneseq  ;;  %v3443_v1 = vmov 0   ;;  %v3099_v4 = vld [vmem:[#allocation8 + $0xac] ss:$12 sps:$4 sm:$0xff]   ;;  %v3444_v16 = vmov 0.0  }
  0x56   :  { %548 = vmatprep.mubr.bf16.mxu0 %v3443_v1  ;;  %v3101_v5 = vld [vmem:[#allocation8 + $0xa8] ss:$12 sps:$4 sm:$0xff]   ;;  %516 = vmatprep.subr.bf16.mxu0 %v3099_v4  ;;  %v3104_v8 = vld [vmem:[#allocation8 + $0x90] ss:$12 sps:$4 sm:$0xff]   ;;  %v3107_v12 = vld [vmem:[#allocation8 + $0x78] ss:$12 sps:$4 sm:$0xff]  }
  0x57   :  { %v3520_v2 = vshrl.u32 %v119_v0, 7  ;;  %v3102_v6 = vld [vmem:[#allocation8 + $0x94] ss:$12 sps:$4 sm:$0xff]   ;;  %517 = vmatpush1.bf16.msra.mxu0 %v3101_v5  ;;  %v3105_v10 = vld [vmem:[#allocation8 + $0x7c] ss:$12 sps:$4 sm:$0xff]   ;;  %v3536_v22 = vld [vmem:[#allocation2 + $0x18] sm:$0xff] }
  0x58   :  { %518 = vmatprep.subr.bf16.mxu0 %v3102_v6  ;;  %v3108_v13 = vld [vmem:[#allocation8 + $0x64] ss:$12 sps:$4 sm:$0xff]   ;;  %v3110_v14 = vld [vmem:[#allocation8 + $0x60] ss:$12 sps:$4 sm:$0xff]   ;;  %v3530_v18 = vld [vmem:[#allocation2] sm:$0xff]  ;;  %vm657_vm2 = vcmask 523264  }
  0x59   :  { %v123_v3 = vadd.s32 24, %v3520_v2  ;;  %v127_v7 = vadd.s32 56, %v3520_v2  ;;  %v3532_v19 = vld [vmem:[#allocation2 + $0x8] sm:$0xff]  ;;  %v3534_v20 = vld [vmem:[#allocation2 + $0x10] sm:$0xff]  ;;  %v3111_v21 = vld [vmem:[#allocation8 + $0x4c] ss:$12 sps:$4 sm:$0xff]   ;;  %v296_v25 = vmul.f32 %v3530_v18, %v3530_v18 }
  0x5a   :  { %v3538_v23 = vld [vmem:[#allocation2 + $0x20] sm:$0xff]  ;;  %v282_v24 = vadd.f32 %v3532_v19, %v3530_v18  ;;  %v297_v26 = vmul.f32 %v3532_v19, %v3532_v19  ;;  %v298_v27 = vmul.f32 %v3534_v20, %v3534_v20  ;;  %v3552_v30 = vld [vmem:[#allocation2 + $0x28] sm:$0xff]  ;;  %v3554_v31 = vld [vmem:[#allocation2 + $0x38] sm:$0xff]  ;;  %vm886_vm4 = vcmask 261120   ;;  %s3446_s4 = smov [#allocation14]  }
  0x5b   :  { %v153_v9 = vand.u32 31, %v123_v3  ;;  %v181_v11 = vand.u32 31, %v127_v7  ;;  %519 = vmatpush1.bf16.msra.mxu0 %v3104_v8  ;;  %v3113_v28 = vld [vmem:[#allocation8 + $0x48] ss:$12 sps:$4 sm:$0xff]   ;;  %v3123_v35 = vld [vmem:[#allocation8 + $0xb0] ss:$12 sps:$4 sm:$0xff]   ;;  %v300_v40 = vmul.f32 %v3538_v23, %v3538_v23  ;;  %v301_v45 = vmul.f32 %v3552_v30, %v3552_v30 }
  0x5c   :  { %520 = vmatprep.subr.bf16.mxu0 %v3105_v10  ;;  %v283_v33 = vadd.f32 %v282_v24, %v3534_v20  ;;  %v304_v34 = vadd.f32 %v297_v26, %v296_v25  ;;  %v3124_v37 = vld [vmem:[#allocation8 + $0x98] ss:$12 sps:$4 sm:$0xff]   ;;  %v3114_v38 = vld [vmem:[#allocation8 + $0x34] ss:$12 sps:$4 sm:$0xff]   ;;  %2914 = vmatprep.subr.bf16.mxu1 %v3123_v35  ;;  %v3116_v48 = vld [vmem:[#allocation8 + $0x30] ss:$12 sps:$4 sm:$0xff]  }
  0x5d   :  { %vm227_vm0 = vcmp.lt.s32.totalorder %v153_v9, 31  ;;  %vm3524_vm1 = vcmp.lt.s32.totalorder %v181_v11, 31  ;;  %v3562_v42 = vld [vmem:[#allocation2 + $0x30] sm:$0xff]  ;;  %2915 = vmatpush3.bf16.msra.mxu1 %v3123_v35  ;;  %v3125_v47 = vld [vmem:[#allocation8 + $0x80] ss:$12 sps:$4 sm:$0xff]   ;;  %s2645_s6 = sshll.u32 %s3446_s4, 4  ;;  %s2646_s6 = int_to_ptr.vmem [resolvable:$true] %s2645_s6 }
  0x5e   :  { %v3528_v17 = vsel %vm227_vm0, 1.0, %v3444_v16  ;;  %v3550_v29 = vsel %vm3524_vm1, 1.0, %v3444_v16  ;;  %v305_v41 = vadd.f32 %v304_v34, %v298_v27  ;;  %2916 = vmatprep.subr.bf16.mxu1 %v3124_v37  ;;  %v3117_v49 = vld [vmem:[#allocation8 + $0x1c] ss:$12 sps:$4 sm:$0xff]   ;;  %v302_v51 = vmul.f32 %v3562_v42, %v3562_v42  ;;  %v3119_v53 = vld [vmem:[#allocation8 + $0x18] ss:$12 sps:$4 sm:$0xff]   ;;  %p3405_p8 = scmp.lt.s32.totalorder %s2646_s6, %s2646_s6 }
  0x5f   :  { %521 = vmatpush1.bf16.msra.mxu0 %v3107_v12  ;;  %v277_v32 = vmul.f32 %v3528_v17, %v3536_v22  ;;  %v281_v43 = vmul.f32 %v3550_v29, %v3554_v31  ;;  %v3126_v54 = vld [vmem:[#allocation8 + $0x68] ss:$12 sps:$4 sm:$0xff]   ;;  %v3120_v55 = vld [vmem:[#allocation8 + $0x4] ss:$12 sps:$4 sm:$0xff]   ;;  %v3122_v62 = vld [vmem:[#allocation8] ss:$12 sps:$4 sm:$0xff]  }
  0x60   :  { %522 = vmatprep.subr.bf16.mxu0 %v3108_v13  ;;  %v3127_v61 = vld [vmem:[#allocation8 + $0x50] ss:$12 sps:$4 sm:$0xff]   ;;  %v3128_v6 = vld [vmem:[#allocation8 + $0x38] ss:$12 sps:$4 sm:$0xff]   ;;  %v3129_v11 = vld [vmem:[#allocation8 + $0x20] ss:$12 sps:$4 sm:$0xff]  }
  0x61   :  { %v299_v36 = vmul.f32 %v277_v32, %v3536_v22  ;;  %v284_v39 = vadd.f32 %v283_v33, %v277_v32  ;;  %2917 = vmatpush3.bf16.msra.mxu1 %v3124_v37  ;;  %v303_v57 = vmul.f32 %v281_v43, %v3554_v31  ;;  %v3130_v16 = vld [vmem:[#allocation8 + $0x8] ss:$12 sps:$4 sm:$0xff]   ;;  %v3575_v33 = vsub.s32 0, %v3520_v2  ;;  %s3400_s14 = scalar_lea.vmem %s2646_s6, 1024 }
  0x62   :  { %2918 = vmatprep.subr.bf16.mxu1 %v3125_v47  ;;  %v248_v32 = vld [vmem:[#allocation5] sm:$0xff]  ;;  %p3401_p7 = scmp.ne.s32.totalorder %s2646_s6, %s3400_s14  ;;  %p3406_p9 = scmp.lt.s32.totalorder %s3400_s14, %s3400_s14 }
  0x63   :  { %523 = vmatpush1.bf16.msra.mxu0 %v3110_v14  ;;  %v285_v44 = vadd.f32 %v284_v39, %v3538_v23  ;;  %v306_v46 = vadd.f32 %v305_v41, %v299_v36  ;;  %v3579_v39 = vsub.s32 1, %v3520_v2 }
  0x64   :  { %524 = vmatprep.subr.bf16.mxu0 %v3111_v21  ;;  %p3407_p10 = por %p3406_p9, %p3405_p8 }
  0x65   :  { %v286_v50 = vadd.f32 %v285_v44, %v3552_v30  ;;  %v307_v52 = vadd.f32 %v306_v46, %v300_v40  ;;  %2919 = vmatpush3.bf16.msra.mxu1 %v3125_v47 }
  0x66   :  { %2920 = vmatprep.subr.bf16.mxu1 %v3126_v54  ;;  %p3408_p11 = pnand %p3407_p10, %p3401_p7 }
  0x67   :  { %525 = vmatpush1.bf16.msra.mxu0 %v3113_v28  ;;  %v287_v56 = vadd.f32 %v286_v50, %v3562_v42  ;;  %v308_v58 = vadd.f32 %v307_v52, %v301_v45 }
  0x68   :  { %526 = vmatprep.subr.bf16.mxu0 %v3114_v38 }
  0x69   :  { %v288_v59 = vadd.f32 %v287_v56, %v281_v43  ;;  %v309_v60 = vadd.f32 %v308_v58, %v302_v51  ;;  %2921 = vmatpush3.bf16.msra.mxu1 %v3126_v54 }
  0x6a   :  { %2922 = vmatprep.subr.bf16.mxu1 %v3127_v61 }
  0x6b   :  { %527 = vmatpush1.bf16.msra.mxu0 %v3116_v48  ;;  %v289_v63 = vrot.slane %v288_v59, 4  ;;  %v310_v3 = vadd.f32 %v309_v60, %v303_v57 }
  0x6c   :  { %528 = vmatprep.subr.bf16.mxu0 %v3117_v49 }
  0x6d   :  { %v290_v4 = vadd.f32 %v289_v63, %v288_v59  ;;  %v311_v5 = vrot.slane %v310_v3, 4  ;;  %2923 = vmatpush3.bf16.msra.mxu1 %v3127_v61 }
  0x6e   :  { %2924 = vmatprep.subr.bf16.mxu1 %v3128_v6 }
  0x6f   :  { %529 = vmatpush1.bf16.msra.mxu0 %v3119_v53  ;;  %v291_v7 = vrot.slane %v290_v4, 2  ;;  %v312_v8 = vadd.f32 %v311_v5, %v310_v3 }
  0x70   :  { %530 = vmatprep.subr.bf16.mxu0 %v3120_v55 }
  0x71   :  { %v292_v9 = vadd.f32 %v291_v7, %v290_v4  ;;  %v313_v10 = vrot.slane %v312_v8, 2  ;;  %2925 = vmatpush3.bf16.msra.mxu1 %v3128_v6 }
  0x72   :  { %2926 = vmatprep.subr.bf16.mxu1 %v3129_v11 }
  0x73   :  { %531 = vmatpush1.bf16.msra.mxu0 %v3122_v62  ;;  %v293_v12 = vrot.slane %v292_v9, 1  ;;  %v314_v13 = vadd.f32 %v313_v10, %v312_v8 }
  0x75   :  { %v294_v14 = vadd.f32 %v293_v12, %v292_v9  ;;  %v315_v15 = vrot.slane %v314_v13, 1  ;;  %2927 = vmatpush3.bf16.msra.mxu1 %v3129_v11 }
  0x76   :  { %2928 = vmatprep.subr.bf16.mxu1 %v3130_v16 }
  0x77   :  { %v295_v21 = vmul.f32 0.016129032, %v294_v14  ;;  %v316_v24 = vadd.f32 %v315_v15, %v314_v13 }
  0x79   :  { %v317_v25 = vmul.f32 0.016129032, %v316_v24  ;;  %v318_v26 = vmul.f32 %v295_v21, %v295_v21  ;;  %2929 = vmatpush3.bf16.msra.mxu1 %v3130_v16 }
  0x7b   :  { %v319_v27 = vsub.f32 %v317_v25, %v318_v26 }
  0x7d   :  { %v320_v28 = vadd.f32 1e-05, %v319_v27  ;;  %v3687_v27 = vand.u32 127, %v119_v0 }
  0x7f   :  { %3179 = vrsqrt.f32 %v320_v28  ;;  %vm656_vm3 = vcmp.lt.s32.totalorder %v3687_v27, 31 }
  0x8c   :  { %v3180_v34 = vpop.eup %3179 }
  0x8d   :  { %v322_v35 = vmul.f32 %v3180_v34, %v248_v32 }
  0x8f   :  { %v323_v36 = vmul.f32 %v322_v35, %v295_v21  ;;  %v331_v37 = vrot.slane %v322_v35, %v3575_v33 }
  0x91   :  { %v325_v38 = vrot.slane %v323_v36, 7  ;;  %v332_v40 = vmul.f32 %v331_v37, %v3530_v18  ;;  %v333_v43 = vmul.f32 %v331_v37, %v3532_v19  ;;  %v334_v44 = vmul.f32 %v331_v37, %v3534_v20 }
  0x92   :  { %v335_v45 = vmul.f32 %v331_v37, %v3536_v22  ;;  %v336_v46 = vmul.f32 %v331_v37, %v3538_v23  ;;  %v337_v47 = vmul.f32 %v331_v37, %v3552_v30  ;;  %v338_v19 = vmul.f32 %v331_v37, %v3562_v42 }
  0x93   :  { %v327_v41 = vsub.f32 %v248_v32, %v325_v38  ;;  %v339_v20 = vmul.f32 %v331_v37, %v3554_v31 }
  0x95   :  { %v343_v48 = vrot.slane %v327_v41, %v3579_v39 }
  0x97   :  { %v344_v49 = vadd.f32 %v343_v48, %v332_v40  ;;  %v345_v50 = vadd.f32 %v343_v48, %v333_v43  ;;  %v346_v51 = vadd.f32 %v343_v48, %v334_v44  ;;  %v347_v52 = vadd.f32 %v343_v48, %v335_v45 }
  0x98   :  { %v348_v53 = vadd.f32 %v343_v48, %v336_v46  ;;  %v349_v54 = vadd.f32 %v343_v48, %v337_v47  ;;  %v350_v23 = vadd.f32 %v343_v48, %v338_v19  ;;  %v351_v30 = vadd.f32 %v343_v48, %v339_v20 }
  0x99   :  { %v352_v18 = vpack.c.bf16 %v345_v50, %v344_v49  ;;  %v353_v55 = vpack.c.bf16 %v347_v52, %v346_v51 }
  0x9a   :  { %v354_v22 = vpack.c.bf16 %v349_v54, %v348_v53  ;;  %v355_v56 = vpack.c.bf16 %v351_v30, %v350_v23 }
  0x9b   :  { %549 = vmatmul.mubr.bf16.vlgmr.msra.gmra.mxu0 %v352_v18  ;;  %2930 = vmatprep.mubr.bf16.mxu1 %v352_v18 }
  0x9c   :  { %558 = vmatprep.mubr.bf16.mxu0 %v3443_v1  ;;  %2931 = vmatmul.mubr.bf16.vlgmr.msra.gmra.mxu1 %v353_v55 }
  0x9d   :  { %2934 = vmatprep.mubr.bf16.mxu1 %v354_v22 }
  0xa3   :  { %559 = vmatmul.mubr.bf16.gmra.mxu0 %v353_v55 }
  0xa4   :  { %568 = vmatprep.mubr.bf16.mxu0 %v3443_v1  ;;  %2935 = vmatmul.mubr.bf16.gmra.mxu1 %v355_v56 }
  0xab   :  { %569 = vmatmul.mubr.bf16.gmra.mxu0 %v354_v22 }
  0xac   :  { %578 = vmatprep.mubr.bf16.mxu0 %v3443_v1 }
  0xb3   :  { %579 = vmatmul.mubr.bf16.gmra.mxu0 %v355_v56 }
 0x15b   :  { %v3593_v31 = vpop.f32.mrf.mxu0 }
 0x15c   :  { %2946 = vmatprep.mubr.msk.f32.mxu1 %vm657_vm2, %v3593_v31  ;;  %v3616_v4 = vpop.f32.mrf.mxu1 }
 0x15d   :  { %v552_v42 = vpop.f32.mrf.mxu0 }
 0x15e   :  { %1181 = vrot.lane.b32.xlu0 %v552_v42, %s3440_s0  ;;  %v3624_v7 = vpop.f32.mrf.mxu1 }
 0x15f   :  { %v3598_v57 = vpop.f32.mrf.mxu0 }
 0x160   :  { %v3630_v10 = vpop.f32.mrf.mxu1 }
 0x161   :  { %v556_v58 = vpop.f32.mrf.mxu0 }
 0x162   :  { %1183 = vrot.lane.b32.xlu1 %v556_v58, %s3440_s0  ;;  %v3637_v13 = vpop.f32.mrf.mxu1 }
 0x163   :  { %v3601_v59 = vpop.f32.mrf.mxu0 }
 0x164   :  { %v3645_v14 = vpop.f32.mrf.mxu1 }
 0x165   :  { %v562_v60 = vpop.f32.mrf.mxu0 }
 0x166   :  { %1185 = vrot.lane.b32.xlu1 %v562_v60, %s3440_s0  ;;  %v3653_v15 = vpop.f32.mrf.mxu1 }
 0x167   :  { %v3604_v61 = vpop.f32.mrf.mxu0 }
 0x168   :  { %v3662_v16 = vpop.f32.mrf.mxu1 }
 0x169   :  { %v566_v62 = vpop.f32.mrf.mxu0 }
 0x16a   :  { %1187 = vrot.lane.b32.xlu0 %v566_v62, %s3440_s0  ;;  %2938 = vmatprep.subr.msk.mxu1 %vm657_vm2, %v566_v62  ;;  %v3689_v28 = vpop.f32.mrf.mxu1 }
 0x16b   :  { %v3608_v63 = vpop.f32.mrf.mxu0  ;;  %2939 = vmatpush3.xpose.msk.msra.mxu1 %vm657_vm2, %v566_v62 }
 0x16c   :  { %2940 = vmatprep.subr.msk.mxu1 %vm657_vm2, %v562_v60  ;;  %2960 = vmatprep.mubr.msk.f32.mxu0 %vm657_vm2, %v3608_v63 }
 0x16d   :  { %v3614_v3 = vpop.f32.mrf.mxu0 }
 0x16f   :  { %v3618_v5 = vpop.f32.mrf.mxu0  ;;  %2941 = vmatpush3.xpose.msk.msra.mxu1 %vm657_vm2, %v562_v60 }
 0x170   :  { %2942 = vmatprep.subr.msk.mxu1 %vm657_vm2, %v556_v58 }
 0x171   :  { %v3622_v6 = vpop.f32.mrf.mxu0 }
 0x173   :  { %v3626_v8 = vpop.f32.mrf.mxu0  ;;  %2943 = vmatpush3.xpose.msk.msra.mxu1 %vm657_vm2, %v556_v58 }
 0x174   :  { %2944 = vmatprep.subr.msk.mxu1 %vm657_vm2, %v552_v42 }
 0x175   :  { %v582_v9 = vpop.f32.mrf.mxu0 }
 0x176   :  { %1302 = vrot.lane.b32.xlu1 %v582_v9, %s3440_s0 }
 0x177   :  { %v3633_v11 = vpop.f32.mrf.mxu0  ;;  %2945 = vmatpush3.xpose.msk.msra.mxu1 %vm657_vm2, %v552_v42 }
 0x178   :  { %2966 = vmatprep.subr.mxu1 %v3630_v10 }
 0x179   :  { %v586_v12 = vpop.f32.mrf.mxu0 }
 0x17a   :  { %2947 = vmatmul.mubr.msk.f32.vlgmr.msra.gmra.mxu1 %vm657_vm2, %v3598_v57  ;;  %1304 = vrot.lane.b32.xlu1 %v586_v12, %s3440_s0 }
 0x17b   :  { %2952 = vmatprep.subr.msk.mxu0 %vm657_vm2, %v586_v12  ;;  %2949 = vmatprep.mubr.msk.f32.mxu1 %vm657_vm2, %v3601_v59 }
 0x17c   :  { %2953 = vmatpush3.xpose.msk.msra.mxu0 %vm657_vm2, %v586_v12  ;;  %2967 = vmatpush3.msra.mxu1 %v3630_v10 }
 0x17d   :  { %2954 = vmatprep.subr.msk.mxu0 %vm657_vm2, %v582_v9  ;;  %2968 = vmatprep.subr.mxu1 %v3616_v4 }
 0x17e   :  { %2950 = vmatmul.mubr.msk.f32.gmra.mxu1 %vm657_vm2, %v3604_v61 }
 0x17f   :  { %2969 = vmatpush3.msra.mxu1 %v3616_v4 }
 0x180   :  { %2955 = vmatpush3.xpose.msk.msra.mxu0 %vm657_vm2, %v582_v9  ;;  %2970 = vmatprep.subr.mxu1 %v3637_v13 }
 0x181   :  { %2956 = vmatprep.subr.msk.mxu0 %vm657_vm2, %v3622_v6  ;;  %2971 = vmatpush3.msra.mxu1 %v3637_v13 }
 0x182   :  { %2972 = vmatprep.subr.mxu1 %v3624_v7 }
 0x183   :  { %2973 = vmatpush3.msra.mxu1 %v3624_v7 }
 0x184   :  { %2957 = vmatpush3.xpose.msk.msra.mxu0 %vm657_vm2, %v3622_v6  ;;  %2980 = vmatprep.subr.mxu1 %v3662_v16 }
 0x185   :  { %2958 = vmatprep.subr.msk.mxu0 %vm657_vm2, %v3614_v3 }
 0x188   :  { %2959 = vmatpush3.xpose.msk.msra.mxu0 %vm657_vm2, %v3614_v3 }
 0x18b   :  { %2961 = vmatmul.mubr.msk.f32.vlgmr.msra.gmra.mxu0 %vm657_vm2, %v3618_v5 }
 0x18c   :  { %2963 = vmatprep.mubr.msk.f32.mxu0 %vm657_vm2, %v3626_v8 }
 0x18f   :  { %2964 = vmatmul.mubr.msk.f32.gmra.mxu0 %vm657_vm2, %v3633_v11 }
 0x1d0   :  { %v1182_v21 = vpop.permute.xlu0 %1181 }
 0x1d4   :  { %v1184_v24 = vpop.permute.xlu1 %1183 }
 0x1d8   :  { %v1186_v26 = vpop.permute.xlu1 %1185 }
 0x1dc   :  { %v1188_v25 = vpop.permute.xlu0 %1187 }
 0x1dd   :  { %2994 = vmatprep.subr.msk.mxu0 %vm657_vm2, %v1188_v25 }
 0x1de   :  { %2995 = vmatpush3.xpose.msk.msra.mxu0 %vm657_vm2, %v1188_v25 }
 0x1df   :  { %2996 = vmatprep.subr.msk.mxu0 %vm657_vm2, %v1186_v26 }
 0x1e2   :  { %2997 = vmatpush3.xpose.msk.msra.mxu0 %vm657_vm2, %v1186_v26 }
 0x1e3   :  { %2998 = vmatprep.subr.msk.mxu0 %vm657_vm2, %v1184_v24 }
 0x1e6   :  { %2999 = vmatpush3.xpose.msk.msra.mxu0 %vm657_vm2, %v1184_v24 }
 0x1e7   :  { %3000 = vmatprep.subr.msk.mxu0 %vm657_vm2, %v1182_v21 }
 0x1e8   :  { %v3723_v20 = vpop.permute.xlu1 %1302 }
 0x1ea   :  { %3001 = vmatpush3.xpose.msk.msra.mxu0 %vm657_vm2, %v1182_v21 }
 0x1ec   :  { %v3725_v22 = vpop.permute.xlu1 %1304 }
 0x23a   :  { %v2948_v32 = vpop.f32.mrf.mxu1 }
 0x23b   :  { %v879_v34 = vsel %vm656_vm3, %v2948_v32, -1e+30 }
 0x23c   :  { %v748_v35 = vpop.f32.mrf.mxu1  ;;  %v890_v36 = vsel %vm886_vm4, %v879_v34, -inf }
 0x23d   :  { %v878_v37 = vsel %vm656_vm3, %v748_v35, -1e+30  ;;  %891 = vmax.xlane.f32.xlu0 %v890_v36 }
 0x23e   :  { %v2951_v38 = vpop.f32.mrf.mxu1  ;;  %v887_v41 = vsel %vm886_vm4, %v878_v37, -inf }
 0x23f   :  { %v881_v0 = vsel %vm656_vm3, %v2951_v38, -1e+30 }
 0x240   :  { %v758_v40 = vpop.f32.mrf.mxu1  ;;  %v896_v43 = vsel %vm886_vm4, %v881_v0, -inf }
 0x241   :  { %v880_v44 = vsel %vm656_vm3, %v758_v40, -1e+30  ;;  %888 = vmax.xlane.f32.xlu0 %v887_v41  ;;  %897 = vmax.xlane.f32.xlu1 %v896_v43 }
 0x242   :  { %v893_v45 = vsel %vm886_vm4, %v880_v44, -inf }
 0x245   :  { %894 = vmax.xlane.f32.xlu1 %v893_v45 }
 0x24b   :  { %v2962_v46 = vpop.f32.mrf.mxu0 }
 0x24c   :  { %v883_v47 = vsel %vm656_vm3, %v2962_v46, -1e+30 }
 0x24d   :  { %v857_v48 = vpop.f32.mrf.mxu0  ;;  %v902_v49 = vsel %vm886_vm4, %v883_v47, -inf }
 0x24e   :  { %v882_v50 = vsel %vm656_vm3, %v857_v48, -1e+30  ;;  %903 = vmax.xlane.f32.xlu1 %v902_v49 }
 0x24f   :  { %v2965_v51 = vpop.f32.mrf.mxu0  ;;  %v899_v52 = vsel %vm886_vm4, %v882_v50, -inf }
 0x250   :  { %v3712_v53 = vsel %vm656_vm3, %v2965_v51, -1e+30  ;;  %900 = vmax.xlane.f32.xlu0 %v899_v52 }
 0x251   :  { %v867_v54 = vpop.f32.mrf.mxu0  ;;  %v908_v18 = vsel %vm886_vm4, %v3712_v53, -inf }
 0x252   :  { %v884_v55 = vsel %vm656_vm3, %v867_v54, -1e+30  ;;  %909 = vmax.xlane.f32.xlu1 %v908_v18 }
 0x253   :  { %v905_v19 = vsel %vm886_vm4, %v884_v55, -inf }
 0x254   :  { %906 = vmax.xlane.f32.xlu0 %v905_v19 }
 0x263   :  { %1175 = vrot.lane.b32.xlu1 %v3598_v57, %s3440_s0 }
 0x26a   :  { %1173 = vrot.lane.b32.xlu0 %v3593_v31, %s3440_s0 }
 0x2c6   :  { %v892_v23 = vpop.xlane.xlu0 %891 }
 0x2c7   :  { %v912_v30 = vsub.f32 %v879_v34, %v892_v23 }
 0x2c9   :  { %v921_v56 = vmul.f32 1.442695, %v912_v30 }
 0x2ca   :  { %v889_v42 = vpop.xlane.xlu0 %888  ;;  %v898_v58 = vpop.xlane.xlu1 %897 }
 0x2cb   :  { %3181 = vpow2.f32 %v921_v56  ;;  %v911_v60 = vsub.f32 %v878_v37, %v889_v42  ;;  %v914_v62 = vsub.f32 %v881_v0, %v898_v58 }
 0x2cd   :  { %v919_v9 = vmul.f32 1.442695, %v911_v60  ;;  %v925_v12 = vmul.f32 1.442695, %v914_v62 }
 0x2ce   :  { %v895_v21 = vpop.xlane.xlu1 %894 }
 0x2cf   :  { %3183 = vpow2.f32 %v919_v9  ;;  %v913_v57 = vsub.f32 %v880_v44, %v895_v21 }
 0x2d0   :  { %3185 = vpow2.f32 %v925_v12 }
 0x2d1   :  { %v923_v24 = vmul.f32 1.442695, %v913_v57 }
 0x2d3   :  { %3187 = vpow2.f32 %v923_v24 }
 0x2d7   :  { %v904_v31 = vpop.xlane.xlu1 %903 }
 0x2d8   :  { %v3727_v25 = vpop.eup %3181  ;;  %v916_v26 = vsub.f32 %v883_v47, %v904_v31 }
 0x2d9   :  { %v901_v32 = vpop.xlane.xlu0 %900  ;;  %v938_v34 = vsel %vm886_vm4, %v3727_v25, 0.0 }
 0x2da   :  { %v929_v35 = vmul.f32 1.442695, %v916_v26  ;;  %v915_v36 = vsub.f32 %v882_v50, %v901_v32  ;;  %939 = vadd.xlane.f32.xlu1 %v938_v34 }
 0x2db   :  { %v910_v0 = vpop.xlane.xlu1 %909 }
 0x2dc   :  { %v3184_v37 = vpop.eup %3183  ;;  %3189 = vpow2.f32 %v929_v35  ;;  %v927_v38 = vmul.f32 1.442695, %v915_v36  ;;  %v918_v54 = vsub.f32 %v3712_v53, %v910_v0 }
 0x2dd   :  { %v3731_v40 = vpop.eup %3185  ;;  %v907_v41 = vpop.xlane.xlu0 %906  ;;  %v935_v43 = vsel %vm886_vm4, %v3184_v37, 0.0 }
 0x2de   :  { %3191 = vpow2.f32 %v927_v38  ;;  %v944_v44 = vsel %vm886_vm4, %v3731_v40, 0.0  ;;  %936 = vadd.xlane.f32.xlu0 %v935_v43  ;;  %v917_v18 = vsub.f32 %v884_v55, %v907_v41  ;;  %v933_v19 = vmul.f32 1.442695, %v918_v54 }
 0x2df   :  { %945 = vadd.xlane.f32.xlu1 %v944_v44  ;;  %v1176_v48 = vpop.permute.xlu1 %1175 }
 0x2e0   :  { %v3188_v45 = vpop.eup %3187  ;;  %v931_v23 = vmul.f32 1.442695, %v917_v18  ;;  %3193 = vpow2.f32 %v933_v19 }
 0x2e1   :  { %v1174_v46 = vpop.permute.xlu0 %1173  ;;  %v941_v47 = vsel %vm886_vm4, %v3188_v45, 0.0 }
 0x2e2   :  { %3002 = vmatprep.mubr.msk.f32.mxu0 %vm657_vm2, %v1174_v46  ;;  %942 = vadd.xlane.f32.xlu0 %v941_v47  ;;  %3195 = vpow2.f32 %v931_v23 }
 0x2e3   :  { %3003 = vmatmul.mubr.msk.f32.vlgmr.msra.gmra.mxu0 %vm657_vm2, %v1176_v48 }
 0x2e9   :  { %v3739_v49 = vpop.eup %3189 }
 0x2ea   :  { %v950_v50 = vsel %vm886_vm4, %v3739_v49, 0.0 }
 0x2eb   :  { %v3192_v51 = vpop.eup %3191  ;;  %951 = vadd.xlane.f32.xlu1 %v950_v50 }
 0x2ec   :  { %v947_v52 = vsel %vm886_vm4, %v3192_v51, 0.0 }
 0x2ed   :  { %948 = vadd.xlane.f32.xlu0 %v947_v52  ;;  %v3749_v30 = vpop.eup %3193 }
 0x2ee   :  { %v956_v42 = vsel %vm886_vm4, %v3749_v30, 0.0 }
 0x2ef   :  { %v3751_v56 = vpop.eup %3195 }
 0x2fc   :  { %1177 = vrot.lane.b32.xlu1 %v3601_v59, %s3440_s0  ;;  %v953_v59 = vsel %vm886_vm4, %v3751_v56, 0.0 }
 0x303   :  { %1300 = vrot.lane.b32.xlu0 %v3622_v6, %s3440_s0 }
 0x320   :  { %957 = vadd.xlane.f32.xlu1 %v956_v42 }
 0x322   :  { %954 = vadd.xlane.f32.xlu0 %v953_v59 }
 0x331   :  { %1298 = vrot.lane.b32.xlu1 %v3614_v3, %s3440_s0 }
 0x335   :  { %1292 = vrot.lane.b32.xlu1 %v3618_v5, %s3440_s0 }
 0x338   :  { %1179 = vrot.lane.b32.xlu0 %v3604_v61, %s3440_s0 }
 0x339   :  { %1296 = vrot.lane.b32.xlu1 %v3633_v11, %s3440_s0 }
 0x33c   :  { %1290 = vrot.lane.b32.xlu0 %v3608_v63, %s3440_s0 }
 0x340   :  { %1294 = vrot.lane.b32.xlu0 %v3626_v8, %s3440_s0 }
 0x363   :  { %v940_v6 = vpop.xlane.xlu1 %939 }
 0x364   :  { %3197 = vrcp.f32 %v940_v6 }
 0x367   :  { %v937_v53 = vpop.xlane.xlu0 %936 }
 0x368   :  { %v946_v55 = vpop.xlane.xlu1 %945  ;;  %3199 = vrcp.f32 %v937_v53 }
 0x369   :  { %3201 = vrcp.f32 %v946_v55 }
 0x36b   :  { %v943_v3 = vpop.xlane.xlu0 %942 }
 0x36c   :  { %3203 = vrcp.f32 %v943_v3 }
 0x371   :  { %v3198_v5 = vpop.eup %3197 }
 0x372   :  { %v968_v62 = vmul.f32 %v3198_v5, %v3727_v25 }
 0x374   :  { %v952_v58 = vpop.xlane.xlu1 %951 }
 0x375   :  { %v3200_v61 = vpop.eup %3199  ;;  %3205 = vrcp.f32 %v952_v58 }
 0x376   :  { %v949_v60 = vpop.xlane.xlu0 %948  ;;  %v967_v11 = vmul.f32 %v3200_v61, %v3184_v37  ;;  %v3202_v63 = vpop.eup %3201 }
 0x377   :  { %3207 = vrcp.f32 %v949_v60  ;;  %v970_v21 = vmul.f32 %v3202_v63, %v3731_v40 }
 0x378   :  { %v1178_v9 = vpop.permute.xlu1 %1177  ;;  %2974 = vmatprep.mubr.msk.f32.mxu1 %vm886_vm4, %v967_v11 }
 0x379   :  { %v3204_v8 = vpop.eup %3203  ;;  %3005 = vmatprep.mubr.msk.f32.mxu0 %vm657_vm2, %v1178_v9  ;;  %2975 = vmatmul.mubr.msk.f32.vlgmr.msra.gmra.mxu1 %vm886_vm4, %v968_v62 }
 0x37a   :  { %2981 = vmatpush3.msra.mxu1 %v3662_v16  ;;  %v969_v12 = vmul.f32 %v3204_v8, %v3188_v45  ;;  %v1301_v26 = vpop.permute.xlu0 %1300 }
 0x37b   :  { %2982 = vmatprep.subr.mxu1 %v3645_v14 }
 0x37c   :  { %2983 = vmatpush3.msra.mxu1 %v3645_v14  ;;  %2977 = vmatprep.mubr.msk.f32.mxu1 %vm886_vm4, %v969_v12 }
 0x37d   :  { %2984 = vmatprep.subr.mxu1 %v3689_v28  ;;  %2978 = vmatmul.mubr.msk.f32.gmra.mxu1 %vm886_vm4, %v970_v21 }
 0x37e   :  { %2985 = vmatpush3.msra.mxu1 %v3689_v28 }
 0x37f   :  { %2986 = vmatprep.subr.mxu1 %v3653_v15 }
 0x380   :  { %2987 = vmatpush3.msra.mxu1 %v3653_v15 }
 0x381   :  { %3008 = vmatprep.subr.msk.mxu1 %vm657_vm2, %v3725_v22 }
 0x382   :  { %v3206_v57 = vpop.eup %3205 }
 0x383   :  { %v972_v25 = vmul.f32 %v3206_v57, %v3739_v49 }
 0x384   :  { %v3208_v24 = vpop.eup %3207 }
 0x385   :  { %v971_v31 = vmul.f32 %v3208_v24, %v3192_v51 }
 0x387   :  { %2988 = vmatprep.mubr.msk.f32.mxu1 %vm886_vm4, %v971_v31 }
 0x388   :  { %2989 = vmatmul.mubr.msk.f32.vlgmr.msra.gmra.mxu1 %vm886_vm4, %v972_v25 }
 0x389   :  { %3009 = vmatpush3.xpose.msk.msra.mxu1 %vm657_vm2, %v3725_v22 }
 0x38a   :  { %3010 = vmatprep.subr.msk.mxu1 %vm657_vm2, %v3723_v20 }
 0x38d   :  { %3011 = vmatpush3.xpose.msk.msra.mxu1 %vm657_vm2, %v3723_v20 }
 0x38e   :  { %3012 = vmatprep.subr.msk.mxu1 %vm657_vm2, %v1301_v26 }
 0x391   :  { %3013 = vmatpush3.xpose.msk.msra.mxu1 %vm657_vm2, %v1301_v26 }
 0x3a3   :  { %v3004_v32 = vpop.f32.mrf.mxu0 }
 0x3a4   :  { %v1408_v34 = vsel %vm656_vm3, %v3004_v32, -1e+30 }
 0x3a5   :  { %v1271_v35 = vpop.f32.mrf.mxu0  ;;  %v1418_v36 = vsel %vm886_vm4, %v1408_v34, -inf }
 0x3a6   :  { %v1407_v22 = vsel %vm656_vm3, %v1271_v35, -1e+30  ;;  %1419 = vmax.xlane.f32.xlu1 %v1418_v36 }
 0x3a7   :  { %v1415_v37 = vsel %vm886_vm4, %v1407_v22, -inf }
 0x3a8   :  { %1416 = vmax.xlane.f32.xlu0 %v1415_v37 }
 0x3a9   :  { %v958_v38 = vpop.xlane.xlu1 %957 }
 0x3aa   :  { %3209 = vrcp.f32 %v958_v38 }
 0x3ab   :  { %v955_v20 = vpop.xlane.xlu0 %954 }
 0x3ac   :  { %3211 = vrcp.f32 %v955_v20 }
 0x3ad   :  { %v1299_v0 = vpop.permute.xlu1 %1298 }
 0x3ae   :  { %3014 = vmatprep.subr.msk.mxu1 %vm657_vm2, %v1299_v0 }
 0x3af   :  { %3015 = vmatpush3.xpose.msk.msra.mxu1 %vm657_vm2, %v1299_v0  ;;  %v1180_v40 = vpop.permute.xlu0 %1179 }
 0x3b0   :  { %3006 = vmatmul.mubr.msk.f32.gmra.mxu0 %vm657_vm2, %v1180_v40 }
 0x3b1   :  { %v1293_v47 = vpop.permute.xlu1 %1292 }
 0x3b3   :  { %v1291_v45 = vpop.permute.xlu0 %1290 }
 0x3b5   :  { %v1297_v49 = vpop.permute.xlu1 %1296 }
 0x3b7   :  { %v3210_v41 = vpop.eup %3209  ;;  %v1295_v48 = vpop.permute.xlu0 %1294 }
 0x3b8   :  { %v974_v46 = vmul.f32 %v3210_v41, %v3749_v30 }
 0x3b9   :  { %v3212_v43 = vpop.eup %3211 }
 0x3ba   :  { %v973_v44 = vmul.f32 %v3212_v43, %v3751_v56 }
 0x3bc   :  { %2991 = vmatprep.mubr.msk.f32.mxu1 %vm886_vm4, %v973_v44 }
 0x3bd   :  { %2992 = vmatmul.mubr.msk.f32.gmra.mxu1 %vm886_vm4, %v974_v46 }
 0x3be   :  { %3016 = vmatprep.mubr.msk.f32.mxu1 %vm657_vm2, %v1291_v45 }
 0x3c1   :  { %3017 = vmatmul.mubr.msk.f32.vlgmr.msra.gmra.mxu1 %vm657_vm2, %v1293_v47 }
 0x3c2   :  { %3019 = vmatprep.mubr.msk.f32.mxu1 %vm657_vm2, %v1295_v48 }
 0x3c5   :  { %3020 = vmatmul.mubr.msk.f32.gmra.mxu1 %vm657_vm2, %v1297_v49 }
 0x42f   :  { %v1420_v42 = vpop.xlane.xlu1 %1419 }
 0x430   :  { %v1440_v55 = vsub.f32 %v1408_v34, %v1420_v42 }
 0x431   :  { %v1417_v6 = vpop.xlane.xlu0 %1416 }
 0x432   :  { %v1439_v58 = vsub.f32 %v1407_v22, %v1417_v6  ;;  %v1449_v60 = vmul.f32 1.442695, %v1440_v55 }
 0x434   :  { %v1447_v62 = vmul.f32 1.442695, %v1439_v58  ;;  %3213 = vpow2.f32 %v1449_v60 }
 0x436   :  { %3215 = vpow2.f32 %v1447_v62 }
 0x439   :  { %v3813_v50 = vpop.f32.mrf.mxu1 }
 0x43b   :  { %v3815_v51 = vpop.f32.mrf.mxu1 }
 0x43c   :  { %v1169_v52 = vpack.c.bf16 %v3813_v50, %v3815_v51 }
 0x43d   :  { %v3819_v54 = vpop.f32.mrf.mxu1 }
 0x43f   :  { %v3821_v18 = vpop.f32.mrf.mxu1 }
 0x440   :  { %v1170_v19 = vpack.c.bf16 %v3819_v54, %v3821_v18 }
 0x441   :  { %v3852_v36 = vpop.eup %3213 }
 0x442   :  { %v1466_v20 = vsel %vm886_vm4, %v3852_v36, 0.0 }
 0x443   :  { %v3216_v38 = vpop.eup %3215 }
 0x444   :  { %v1463_v0 = vsel %vm886_vm4, %v3216_v38, 0.0 }
 0x448   :  { %v3825_v23 = vpop.f32.mrf.mxu1 }
 0x44a   :  { %v3827_v30 = vpop.f32.mrf.mxu1 }
 0x44b   :  { %v1171_v56 = vpack.c.bf16 %v3825_v23, %v3827_v30 }
 0x470   :  { %v3007_v59 = vpop.f32.mrf.mxu0 }
 0x471   :  { %v1410_v61 = vsel %vm656_vm3, %v3007_v59, -1e+30 }
 0x472   :  { %v1281_v53 = vpop.f32.mrf.mxu0  ;;  %v1424_v11 = vsel %vm886_vm4, %v1410_v61, -inf }
 0x473   :  { %v1409_v3 = vsel %vm656_vm3, %v1281_v53, -1e+30 }
 0x474   :  { %v1421_v5 = vsel %vm886_vm4, %v1409_v3, -inf }
 0x475   :  { %1422 = vmax.xlane.f32.xlu0 %v1421_v5 }
 0x479   :  { %1425 = vmax.xlane.f32.xlu0 %v1424_v11 }
 0x47d   :  { %v3837_v63 = vpop.f32.mrf.mxu1 }
 0x47f   :  { %v3839_v9 = vpop.f32.mrf.mxu1 }
 0x480   :  { %v1172_v8 = vpack.c.bf16 %v3837_v63, %v3839_v9  ;;  %v3141_v9 = vld [vmem:[#allocation11 + $0x74] ss:$8 sps:$4 sm:$0xff]  }
 0x481   :  { %v3018_v12 = vpop.f32.mrf.mxu1 }
 0x482   :  { %v1412_v21 = vsel %vm656_vm3, %v3018_v12, -1e+30 }
 0x483   :  { %v1388_v57 = vpop.f32.mrf.mxu1  ;;  %v1430_v24 = vsel %vm886_vm4, %v1412_v21, -inf }
 0x484   :  { %v1411_v31 = vsel %vm656_vm3, %v1388_v57, -1e+30  ;;  %1431 = vmax.xlane.f32.xlu1 %v1430_v24 }
 0x485   :  { %v3021_v25 = vpop.f32.mrf.mxu1  ;;  %v1427_v26 = vsel %vm886_vm4, %v1411_v31, -inf }
 0x486   :  { %v1414_v32 = vsel %vm656_vm3, %v3021_v25, -1e+30  ;;  %1428 = vmax.xlane.f32.xlu0 %v1427_v26 }
 0x487   :  { %v1398_v34 = vpop.f32.mrf.mxu1  ;;  %v1436_v35 = vsel %vm886_vm4, %v1414_v32, -inf }
 0x488   :  { %v1413_v22 = vsel %vm656_vm3, %v1398_v34, -1e+30  ;;  %1437 = vmax.xlane.f32.xlu1 %v1436_v35 }
 0x489   :  { %v1433_v37 = vsel %vm886_vm4, %v1413_v22, -inf }
 0x48a   :  { %1434 = vmax.xlane.f32.xlu0 %v1433_v37 }
 0x48c   :  { %1467 = vadd.xlane.f32.xlu1 %v1466_v20 }
 0x48e   :  { %1464 = vadd.xlane.f32.xlu0 %v1463_v0 }
 0x4fe   :  { %v1423_v40 = vpop.xlane.xlu0 %1422 }
 0x4ff   :  { %v1441_v41 = vsub.f32 %v1409_v3, %v1423_v40  ;;  %v3136_v40 = vld [vmem:[#allocation10 + $0x30] sm:$0xff]  }
 0x501   :  { %v1451_v43 = vmul.f32 1.442695, %v1441_v41 }
 0x502   :  { %v1426_v44 = vpop.xlane.xlu0 %1425 }
 0x503   :  { %3217 = vpow2.f32 %v1451_v43  ;;  %v1442_v45 = vsub.f32 %v1410_v61, %v1426_v44 }
 0x505   :  { %v1453_v27 = vmul.f32 1.442695, %v1442_v45 }
 0x507   :  { %3219 = vpow2.f32 %v1453_v27 }
 0x50d   :  { %v1432_v58 = vpop.xlane.xlu1 %1431 }
 0x50e   :  { %v1444_v61 = vsub.f32 %v1412_v21, %v1432_v58 }
 0x50f   :  { %v1429_v46 = vpop.xlane.xlu0 %1428 }
 0x510   :  { %v3860_v47 = vpop.eup %3217  ;;  %v1443_v3 = vsub.f32 %v1411_v31, %v1429_v46  ;;  %v1457_v11 = vmul.f32 1.442695, %v1444_v61  ;;  %v3138_v61 = vld [vmem:[#allocation10 + $0x20] sm:$0xff]  }
 0x511   :  { %v1469_v48 = vsel %vm886_vm4, %v3860_v47, 0.0  ;;  %v1438_v60 = vpop.xlane.xlu1 %1437 }
 0x512   :  { %1470 = vadd.xlane.f32.xlu0 %v1469_v48 }
 0x513   :  { %v1435_v49 = vpop.xlane.xlu0 %1434 }
 0x514   :  { %v3864_v42 = vpop.eup %3219  ;;  %v1445_v5 = vsub.f32 %v1413_v22, %v1435_v49 }
 0x515   :  { %v1472_v59 = vsel %vm886_vm4, %v3864_v42, 0.0  ;;  %v1468_v25 = vpop.xlane.xlu1 %1467 }
 0x516   :  { %1473 = vadd.xlane.f32.xlu1 %v1472_v59 }
 0x517   :  { %v1465_v6 = vpop.xlane.xlu0 %1464 }
 0x518   :  { %3221 = vrcp.f32 %v1465_v6 }
 0x525   :  { %v3222_v53 = vpop.eup %3221 }
 0x526   :  { %v1495_v55 = vmul.f32 %v3222_v53, %v3216_v38  ;;  %v3135_v38 = vld [vmem:[#allocation10 + $0x38] sm:$0xff]  }
 0x527   :  { %1511 = vrot.lane.b32.xlu1 %v3616_v4, %s3440_s0  ;;  %v1455_v4 = vmul.f32 1.442695, %v1443_v3  ;;  %v3137_v3 = vld [vmem:[#allocation10 + $0x28] sm:$0xff]  }
 0x528   :  { %1513 = vrot.lane.b32.xlu0 %v3630_v10, %s3440_s0  ;;  %3030 = vmatprep.mubr.msk.f32.mxu0 %vm886_vm4, %v1495_v55  ;;  %v1459_v10 = vmul.f32 1.442695, %v1445_v5  ;;  %v3132_v5 = vld [vmem:[#allocation10 + $0x10] sm:$0xff]  }
 0x529   :  { %3223 = vpow2.f32 %v1455_v4 }
 0x52a   :  { %3225 = vpow2.f32 %v1459_v10 }
 0x52b   :  { %1509 = vrot.lane.b32.xlu1 %v3637_v13, %s3440_s0  ;;  %v1446_v13 = vsub.f32 %v1414_v32, %v1438_v60  ;;  %3227 = vpow2.f32 %v1457_v11  ;;  %v3133_v11 = vld [vmem:[#allocation10 + $0x8] sm:$0xff]  }
 0x52c   :  { %1626 = vrot.lane.b32.xlu0 %v3662_v16, %s3440_s0 }
 0x52d   :  { %v1461_v62 = vmul.f32 1.442695, %v1446_v13  ;;  %v3134_v13 = vld [vmem:[#allocation10] sm:$0xff]  }
 0x52f   :  { %1507 = vrot.lane.b32.xlu1 %v3624_v7, %s3440_s0  ;;  %3229 = vpow2.f32 %v1461_v62 }
 0x530   :  { %3231 = vrcp.f32 %v1468_v25  ;;  %v3151_v25 = vld [vmem:[#allocation11 + $0x30] ss:$8 sps:$4 sm:$0xff]  }
 0x533   :  { %1624 = vrot.lane.b32.xlu1 %v3645_v14, %s3440_s0 }
 0x536   :  { %v3881_v16 = vpop.eup %3223 }
 0x537   :  { %v1475_v7 = vsel %vm886_vm4, %v3881_v16, 0.0  ;;  %v3885_v12 = vpop.eup %3225 }
 0x538   :  { %v1481_v14 = vsel %vm886_vm4, %v3885_v12, 0.0  ;;  %v3889_v21 = vpop.eup %3227 }
 0x539   :  { %v1478_v57 = vsel %vm886_vm4, %v3889_v21, 0.0 }
 0x53c   :  { %v3893_v24 = vpop.eup %3229 }
 0x53d   :  { %v1484_v31 = vsel %vm886_vm4, %v3893_v24, 0.0 }
 0x54b   :  { %1476 = vadd.xlane.f32.xlu0 %v1475_v7  ;;  %v3144_v7 = vld [vmem:[#allocation11 + $0x64] ss:$8 sps:$4 sm:$0xff]  }
 0x54f   :  { %1482 = vadd.xlane.f32.xlu0 %v1481_v14  ;;  %v3147_v14 = vld [vmem:[#allocation11 + $0x54] ss:$8 sps:$4 sm:$0xff]  }
 0x557   :  { %1479 = vadd.xlane.f32.xlu1 %v1478_v57  ;;  %v3150_v57 = vld [vmem:[#allocation11 + $0x44] ss:$8 sps:$4 sm:$0xff]  }
 0x55b   :  { %1485 = vadd.xlane.f32.xlu1 %v1484_v31  ;;  %v3153_v31 = vld [vmem:[#allocation11 + $0x34] ss:$8 sps:$4 sm:$0xff]  }
 0x565   :  { %1622 = vrot.lane.b32.xlu0 %v3689_v28, %s3440_s0  ;;  %v3232_v28 = vpop.eup %3231 }
 0x566   :  { %v1496_v0 = vmul.f32 %v3232_v28, %v3852_v36 }
 0x56c   :  { %1620 = vrot.lane.b32.xlu1 %v3653_v15, %s3440_s0 }
 0x59b   :  { %v1471_v26 = vpop.xlane.xlu0 %1470 }
 0x59c   :  { %3233 = vrcp.f32 %v1471_v26  ;;  %v3156_v26 = vld [vmem:[#allocation11 + $0x24] ss:$8 sps:$4 sm:$0xff]  }
 0x59f   :  { %v1474_v32 = vpop.xlane.xlu1 %1473  ;;  %v1514_v34 = vpop.permute.xlu0 %1513 }
 0x5a0   :  { %3235 = vrcp.f32 %v1474_v32  ;;  %3022 = vmatprep.subr.mxu0 %v1514_v34  ;;  %v3154_v32 = vld [vmem:[#allocation11 + $0x20] ss:$8 sps:$4 sm:$0xff]  }
 0x5a1   :  { %3023 = vmatpush3.msra.mxu0 %v1514_v34  ;;  %v3159_v34 = vld [vmem:[#allocation11 + $0x14] ss:$8 sps:$4 sm:$0xff]  }
 0x5a3   :  { %v1512_v35 = vpop.permute.xlu1 %1511  ;;  %v1627_v22 = vpop.permute.xlu0 %1626 }
 0x5a4   :  { %3024 = vmatprep.subr.mxu0 %v1512_v35  ;;  %3036 = vmatprep.subr.mxu1 %v1627_v22 }
 0x5a5   :  { %3025 = vmatpush3.msra.mxu0 %v1512_v35  ;;  %3037 = vmatpush3.msra.mxu1 %v1627_v22  ;;  %v3157_v35 = vld [vmem:[#allocation11 + $0x10] ss:$8 sps:$4 sm:$0xff]   ;;  %v3162_v22 = vld [vmem:[#allocation11 + $0x4] ss:$8 sps:$4 sm:$0xff]  }
 0x5a7   :  { %v1510_v37 = vpop.permute.xlu1 %1509 }
 0x5a8   :  { %3026 = vmatprep.subr.mxu0 %v1510_v37 }
 0x5a9   :  { %3027 = vmatpush3.msra.mxu0 %v1510_v37  ;;  %v3234_v15 = vpop.eup %3233  ;;  %v3160_v37 = vld [vmem:[#allocation11] ss:$8 sps:$4 sm:$0xff]  }
 0x5aa   :  { %v1497_v43 = vmul.f32 %v3234_v15, %v3860_v47 }
 0x5ab   :  { %v1508_v20 = vpop.permute.xlu1 %1507 }
 0x5ac   :  { %3028 = vmatprep.subr.mxu0 %v1508_v20 }
 0x5ad   :  { %v3236_v41 = vpop.eup %3235  ;;  %3029 = vmatpush3.msra.mxu0 %v1508_v20 }
 0x5ae   :  { %3031 = vmatmul.mubr.msk.f32.vlgmr.msra.gmra.mxu0 %vm886_vm4, %v1496_v0  ;;  %3050 = vmatprep.subr.bf16.mxu0 %v3135_v38  ;;  %v1498_v45 = vmul.f32 %v3236_v41, %v3864_v42  ;;  %v3131_v42 = vld [vmem:[#allocation10 + $0x18] sm:$0xff]  }
 0x5af   :  { %v1625_v44 = vpop.permute.xlu1 %1624  ;;  %3033 = vmatprep.mubr.msk.f32.mxu0 %vm886_vm4, %v1497_v43  ;;  %3051 = vmatpush3.bf16.msra.mxu0 %v3135_v38  ;;  %v1937_v43 = vsub.s32 4, %v3520_v2 }
 0x5b0   :  { %3038 = vmatprep.subr.mxu1 %v1625_v44  ;;  %3052 = vmatprep.subr.bf16.mxu0 %v3136_v40 }
 0x5b1   :  { %3039 = vmatpush3.msra.mxu1 %v1625_v44 }
 0x5b2   :  { %3034 = vmatmul.mubr.msk.f32.gmra.mxu0 %vm886_vm4, %v1498_v45 }
 0x5b3   :  { %3053 = vmatpush3.bf16.msra.mxu0 %v3136_v40 }
 0x5b4   :  { %3054 = vmatprep.subr.bf16.mxu0 %v3137_v3 }
 0x5b7   :  { %3055 = vmatpush3.bf16.msra.mxu0 %v3137_v3  ;;  %v3253_v3 = vld [vmem:[#allocation2] sm:$0xff] }
 0x5b8   :  { %3056 = vmatprep.subr.bf16.mxu0 %v3138_v61 }
 0x5bb   :  { %3057 = vmatpush3.bf16.msra.mxu0 %v3138_v61  ;;  %v3254_v61 = vld [vmem:[#allocation2 + $0x10] sm:$0xff] }
 0x5bc   :  { %2141 = vmatprep.subr.bf16.mxu0 %v3141_v9 }
 0x5d4   :  { %v1477_v36 = vpop.xlane.xlu0 %1476 }
 0x5d5   :  { %3237 = vrcp.f32 %v1477_v36  ;;  %v3937_v36 = vld [vmem:[#allocation5] sm:$0xff] }
 0x5d8   :  { %v1483_v27 = vpop.xlane.xlu0 %1482 }
 0x5d9   :  { %3239 = vrcp.f32 %v1483_v27  ;;  %v1938_v27 = vrot.slane %v3937_v36, %v1937_v43 }
 0x5dc   :  { %v1623_v46 = vpop.permute.xlu0 %1622 }
 0x5dd   :  { %3040 = vmatprep.subr.mxu1 %v1623_v46 }
 0x5de   :  { %3041 = vmatpush3.msra.mxu1 %v1623_v46 }
 0x5e0   :  { %v1480_v47 = vpop.xlane.xlu1 %1479 }
 0x5e1   :  { %3241 = vrcp.f32 %v1480_v47 }
 0x5e2   :  { %v3238_v48 = vpop.eup %3237 }
 0x5e3   :  { %v1499_v49 = vmul.f32 %v3238_v48, %v3881_v16 }
 0x5e4   :  { %v1486_v59 = vpop.xlane.xlu1 %1485 }
 0x5e5   :  { %3243 = vrcp.f32 %v1486_v59  ;;  %3044 = vmatprep.mubr.msk.f32.mxu1 %vm886_vm4, %v1499_v49 }
 0x5e6   :  { %v3240_v53 = vpop.eup %3239 }
 0x5e7   :  { %v1501_v58 = vmul.f32 %v3240_v53, %v3885_v12  ;;  %v3142_v12 = vld [vmem:[#allocation11 + $0x60] ss:$8 sps:$4 sm:$0xff]  }
 0x5e8   :  { %v1621_v6 = vpop.permute.xlu1 %1620 }
 0x5e9   :  { %3042 = vmatprep.subr.mxu1 %v1621_v6 }
 0x5ea   :  { %3043 = vmatpush3.msra.mxu1 %v1621_v6  ;;  %v3252_v6 = vld [vmem:[#allocation2 + $0x8] sm:$0xff] }
 0x5eb   :  { %3066 = vmatprep.subr.bf16.mxu1 %v3131_v42 }
 0x5ee   :  { %v3242_v55 = vpop.eup %3241 }
 0x5ef   :  { %v1500_v4 = vmul.f32 %v3242_v55, %v3889_v21  ;;  %v3145_v21 = vld [vmem:[#allocation11 + $0x50] ss:$8 sps:$4 sm:$0xff]  }
 0x5f1   :  { %3045 = vmatmul.mubr.msk.f32.vlgmr.msra.gmra.mxu1 %vm886_vm4, %v1500_v4 }
 0x5f2   :  { %v3244_v10 = vpop.eup %3243  ;;  %3067 = vmatpush3.bf16.msra.mxu1 %v3131_v42  ;;  %3047 = vmatprep.mubr.msk.f32.mxu1 %vm886_vm4, %v1501_v58 }
 0x5f3   :  { %3068 = vmatprep.subr.bf16.mxu1 %v3132_v5  ;;  %v1502_v60 = vmul.f32 %v3244_v10, %v3893_v24  ;;  %v3148_v24 = vld [vmem:[#allocation11 + $0x40] ss:$8 sps:$4 sm:$0xff]  }
 0x5f5   :  { %3048 = vmatmul.mubr.msk.f32.gmra.mxu1 %vm886_vm4, %v1502_v60 }
 0x5f6   :  { %3069 = vmatpush3.bf16.msra.mxu1 %v3132_v5  ;;  %3074 = vmatprep.mubr.msk.bf16.mxu1 %vm657_vm2, %v1169_v52 }
 0x5f7   :  { %3070 = vmatprep.subr.bf16.mxu1 %v3133_v11 }
 0x5fa   :  { %3071 = vmatpush3.bf16.msra.mxu1 %v3133_v11 }
 0x5fb   :  { %3072 = vmatprep.subr.bf16.mxu1 %v3134_v13 }
 0x5fe   :  { %3073 = vmatpush3.bf16.msra.mxu1 %v3134_v13  ;;  %v3255_v13 = vld [vmem:[#allocation2 + $0x18] sm:$0xff] }
 0x601   :  { %3075 = vmatmul.mubr.msk.bf16.vlgmr.msra.gmra.mxu1 %vm657_vm2, %v1170_v19 }
 0x602   :  { %3078 = vmatprep.mubr.msk.bf16.mxu1 %vm657_vm2, %v1171_v56 }
 0x609   :  { %3079 = vmatmul.mubr.msk.bf16.gmra.mxu1 %vm657_vm2, %v1172_v8  ;;  %v3139_v8 = vld [vmem:[#allocation11 + $0x70] ss:$8 sps:$4 sm:$0xff]  }
 0x66e   :  { %v3032_v50 = vpop.f32.mrf.mxu0 }
 0x670   :  { %v1597_v51 = vpop.f32.mrf.mxu0 }
 0x671   :  { %v1729_v52 = vpack.c.bf16 %v3032_v50, %v1597_v51 }
 0x672   :  { %v3035_v62 = vpop.f32.mrf.mxu0 }
 0x673   :  { %3058 = vmatprep.mubr.msk.bf16.mxu0 %vm657_vm2, %v1729_v52 }
 0x674   :  { %v1607_v16 = vpop.f32.mrf.mxu0 }
 0x675   :  { %v1730_v54 = vpack.c.bf16 %v3035_v62, %v1607_v16 }
 0x677   :  { %3059 = vmatmul.mubr.msk.bf16.vlgmr.msra.gmra.mxu0 %vm657_vm2, %v1730_v54 }
 0x678   :  { %2142 = vmatpush1.bf16.msra.mxu0 %v3139_v8 }
 0x679   :  { %2143 = vmatprep.subr.bf16.mxu0 %v3144_v7 }
 0x67c   :  { %2144 = vmatpush1.bf16.msra.mxu0 %v3142_v12 }
 0x67d   :  { %2145 = vmatprep.subr.bf16.mxu0 %v3147_v14 }
 0x680   :  { %2146 = vmatpush1.bf16.msra.mxu0 %v3145_v21 }
 0x681   :  { %2147 = vmatprep.subr.bf16.mxu0 %v3150_v57  ;;  %v3256_v57 = vld [vmem:[#allocation2 + $0x20] sm:$0xff] }
 0x684   :  { %2148 = vmatpush1.bf16.msra.mxu0 %v3148_v24 }
 0x685   :  { %2149 = vmatprep.subr.bf16.mxu0 %v3153_v31 }
 0x688   :  { %2150 = vmatpush1.bf16.msra.mxu0 %v3151_v25 }
 0x689   :  { %2151 = vmatprep.subr.bf16.mxu0 %v3156_v26 }
 0x68c   :  { %2152 = vmatpush1.bf16.msra.mxu0 %v3154_v32 }
 0x68d   :  { %2153 = vmatprep.subr.bf16.mxu0 %v3159_v34 }
 0x690   :  { %2154 = vmatpush1.bf16.msra.mxu0 %v3157_v35  ;;  %v3257_v35 = vld [vmem:[#allocation2 + $0x38] sm:$0xff] }
 0x691   :  { %2155 = vmatprep.subr.bf16.mxu0 %v3162_v22 }
 0x694   :  { %2156 = vmatpush1.bf16.msra.mxu0 %v3160_v37 }
 0x6b1   :  { %v3046_v18 = vpop.f32.mrf.mxu1 }
 0x6b3   :  { %v1710_v19 = vpop.f32.mrf.mxu1 }
 0x6b4   :  { %v1731_v23 = vpack.c.bf16 %v3046_v18, %v1710_v19 }
 0x6b5   :  { %v3049_v30 = vpop.f32.mrf.mxu1 }
 0x6b6   :  { %3062 = vmatprep.mubr.msk.bf16.mxu0 %vm657_vm2, %v1731_v23 }
 0x6b7   :  { %v1720_v56 = vpop.f32.mrf.mxu1 }
 0x6b8   :  { %v1732_v63 = vpack.c.bf16 %v3049_v30, %v1720_v56 }
 0x6ba   :  { %3063 = vmatmul.mubr.msk.bf16.gmra.mxu0 %vm657_vm2, %v1732_v63 }
 0x6bb   :  { %2173 = vmatprep.mubr.bf16.mxu0 %v3443_v1 }
 0x6c1   :  { %v3076_v15 = vpop.f32.mrf.mxu1 }
 0x6c3   :  { %v1904_v20 = vpop.f32.mrf.mxu1 }
 0x6c5   :  { %v3077_v40 = vpop.f32.mrf.mxu1 }
 0x6c7   :  { %v1907_v44 = vpop.f32.mrf.mxu1 }
 0x6c9   :  { %v3080_v42 = vpop.f32.mrf.mxu1 }
 0x6cb   :  { %v1920_v58 = vpop.f32.mrf.mxu1 }
 0x6cd   :  { %v3081_v62 = vpop.f32.mrf.mxu1 }
 0x6cf   :  { %v1923_v7 = vpop.f32.mrf.mxu1 }
 0x737   :  { %v3060_v28 = vpop.f32.mrf.mxu0 }
 0x738   :  { %v1913_v48 = vadd.f32 %v3076_v15, %v3060_v28  ;;  %v3258_v28 = vld [vmem:[#allocation2 + $0x30] sm:$0xff] }
 0x739   :  { %v1803_v38 = vpop.f32.mrf.mxu0 }
 0x73a   :  { %v1905_v46 = vadd.f32 %v1904_v20, %v1803_v38  ;;  %v1941_v55 = vadd.f32 %v1938_v27, %v1913_v48 }
 0x73b   :  { %v3061_v0 = vpop.f32.mrf.mxu0 }
 0x73c   :  { %v1939_v49 = vadd.f32 %v1938_v27, %v1905_v46  ;;  %v1916_v59 = vadd.f32 %v3077_v40, %v3061_v0  ;;  %v3946_v60 = vadd.f32 %v3254_v61, %v1941_v55  ;;  %v3259_v0 = vld [vmem:[#allocation2 + $0x28] sm:$0xff] }
 0x73d   :  { %v1806_v41 = vpop.f32.mrf.mxu0 }
 0x73e   :  { %v1908_v45 = vadd.f32 %v1907_v44, %v1806_v41  ;;  %v3942_v4 = vadd.f32 %v3253_v3, %v1939_v49  ;;  %v1942_v5 = vadd.f32 %v1938_v27, %v1916_v59  ;;  %v1979_v23 = vmul.f32 %v3946_v60, %v3946_v60 }
 0x740   :  { %v1940_v47 = vadd.f32 %v1938_v27, %v1908_v45  ;;  %v1977_v11 = vmul.f32 %v3942_v4, %v3942_v4  ;;  %v3950_v50 = vadd.f32 %v3255_v13, %v1942_v5 }
 0x742   :  { %v3940_v53 = vadd.f32 %v3252_v6, %v1940_v47  ;;  %v1958_v30 = vmul.f32 %v3528_v17, %v3950_v50 }
 0x744   :  { %v1978_v10 = vmul.f32 %v3940_v53, %v3940_v53  ;;  %v1963_v52 = vadd.f32 %v3940_v53, %v3942_v4  ;;  %v1980_v26 = vmul.f32 %v1958_v30, %v3950_v50 }
 0x746   :  { %v1985_v16 = vadd.f32 %v1978_v10, %v1977_v11  ;;  %v1964_v63 = vadd.f32 %v1963_v52, %v3946_v60 }
 0x748   :  { %v1986_v12 = vadd.f32 %v1985_v16, %v1979_v23  ;;  %v1965_v32 = vadd.f32 %v1964_v63, %v1958_v30  ;;  %v2011_v63 = vsub.s32 2, %v3520_v2 }
 0x74a   :  { %v1987_v20 = vadd.f32 %v1986_v12, %v1980_v26  ;;  %v2023_v12 = vsub.s32 3, %v3520_v2 }
 0x77a   :  { %v3064_v51 = vpop.f32.mrf.mxu0 }
 0x77b   :  { %v1929_v18 = vadd.f32 %v3080_v42, %v3064_v51 }
 0x77c   :  { %v1819_v54 = vpop.f32.mrf.mxu0 }
 0x77d   :  { %v1921_v19 = vadd.f32 %v1920_v58, %v1819_v54  ;;  %v1945_v21 = vadd.f32 %v1938_v27, %v1929_v18 }
 0x77e   :  { %v3065_v56 = vpop.f32.mrf.mxu0 }
 0x77f   :  { %v1943_v9 = vadd.f32 %v1938_v27, %v1921_v19  ;;  %v1932_v8 = vadd.f32 %v3081_v62, %v3065_v56  ;;  %v3966_v15 = vadd.f32 %v3258_v28, %v1945_v21 }
 0x780   :  { %v1822_v14 = vpop.f32.mrf.mxu0 }
 0x781   :  { %v3959_v24 = vadd.f32 %v3256_v57, %v1943_v9  ;;  %v1946_v31 = vadd.f32 %v1938_v27, %v1932_v8  ;;  %v1924_v25 = vadd.f32 %v1923_v7, %v1822_v14 }
 0x783   :  { %v1981_v34 = vmul.f32 %v3959_v24, %v3959_v24  ;;  %v3964_v22 = vadd.f32 %v3257_v35, %v1946_v31  ;;  %v1944_v37 = vadd.f32 %v1938_v27, %v1924_v25  ;;  %v1966_v38 = vadd.f32 %v1965_v32, %v3959_v24 }
 0x784   :  { %v1983_v27 = vmul.f32 %v3966_v15, %v3966_v15 }
 0x785   :  { %v3969_v40 = vadd.f32 %v3259_v0, %v1944_v37  ;;  %v1988_v41 = vadd.f32 %v1987_v20, %v1981_v34  ;;  %v1962_v43 = vmul.f32 %v3550_v29, %v3964_v22 }
 0x787   :  { %v1967_v44 = vadd.f32 %v1966_v38, %v3969_v40  ;;  %v1982_v45 = vmul.f32 %v3969_v40, %v3969_v40  ;;  %v1984_v48 = vmul.f32 %v1962_v43, %v3964_v22 }
 0x789   :  { %v1968_v46 = vadd.f32 %v1967_v44, %v3966_v15  ;;  %v1989_v47 = vadd.f32 %v1988_v41, %v1982_v45 }
 0x78b   :  { %v1969_v49 = vadd.f32 %v1968_v46, %v1962_v43  ;;  %v1990_v59 = vadd.f32 %v1989_v47, %v1983_v27 }
 0x78d   :  { %v1970_v42 = vrot.slane %v1969_v49, 4  ;;  %v1991_v6 = vadd.f32 %v1990_v59, %v1984_v48 }
 0x78f   :  { %v1971_v55 = vadd.f32 %v1970_v42, %v1969_v49  ;;  %v1992_v3 = vrot.slane %v1991_v6, 4 }
 0x791   :  { %v1972_v5 = vrot.slane %v1971_v55, 2  ;;  %v1993_v58 = vadd.f32 %v1992_v3, %v1991_v6 }
 0x793   :  { %v1973_v10 = vadd.f32 %v1972_v5, %v1971_v55  ;;  %v1994_v61 = vrot.slane %v1993_v58, 2 }
 0x795   :  { %v1974_v11 = vrot.slane %v1973_v10, 1  ;;  %v1995_v13 = vadd.f32 %v1994_v61, %v1993_v58  ;;  %v3163_v58 = vld [vmem:[#allocation13 + $0x78] sm:$0xff]   ;;  %v3165_v61 = vld [vmem:[#allocation13 + $0x70] sm:$0xff]  }
 0x796   :  { %2874 = vmatprep.subr.bf16.mxu1 %v3163_v58 }
 0x797   :  { %v1975_v51 = vadd.f32 %v1974_v11, %v1973_v10  ;;  %v1996_v52 = vrot.slane %v1995_v13, 1  ;;  %v3164_v10 = vld [vmem:[#allocation13 + $0x38] sm:$0xff]   ;;  %v3166_v11 = vld [vmem:[#allocation13 + $0x30] sm:$0xff]  }
 0x798   :  { %2875 = vmatpush3.bf16.msra.mxu1 %v3164_v10 }
 0x799   :  { %v1976_v62 = vmul.f32 0.016129032, %v1975_v51  ;;  %v1997_v16 = vadd.f32 %v1996_v52, %v1995_v13  ;;  %2876 = vmatprep.subr.bf16.mxu1 %v3165_v61  ;;  %v3167_v13 = vld [vmem:[#allocation13 + $0x68] sm:$0xff]   ;;  %v3169_v52 = vld [vmem:[#allocation13 + $0x60] sm:$0xff]  }
 0x79a   :  { %v3168_v51 = vld [vmem:[#allocation13 + $0x28] sm:$0xff]  }
 0x79b   :  { %v1998_v54 = vmul.f32 0.016129032, %v1997_v16  ;;  %v1999_v18 = vmul.f32 %v1976_v62, %v1976_v62  ;;  %v3172_v16 = vld [vmem:[#allocation13 + $0x18] sm:$0xff]  }
 0x79c   :  { %2877 = vmatpush3.bf16.msra.mxu1 %v3166_v11 }
 0x79d   :  { %v2000_v19 = vsub.f32 %v1998_v54, %v1999_v18  ;;  %2878 = vmatprep.subr.bf16.mxu1 %v3167_v13  ;;  %v3173_v54 = vld [vmem:[#allocation13 + $0x50] sm:$0xff]  }
 0x79e   :  { %v3174_v18 = vld [vmem:[#allocation13 + $0x10] sm:$0xff]  }
 0x79f   :  { %v2001_v23 = vadd.f32 1e-05, %v2000_v19  ;;  %v3175_v19 = vld [vmem:[#allocation13 + $0x48] sm:$0xff]  }
 0x7a0   :  { %2879 = vmatpush3.bf16.msra.mxu1 %v3168_v51 }
 0x7a1   :  { %3245 = vrsqrt.f32 %v2001_v23  ;;  %2880 = vmatprep.subr.bf16.mxu1 %v3169_v52  ;;  %v3176_v23 = vld [vmem:[#allocation13 + $0x8] sm:$0xff]  }
 0x7ae   :  { %v3246_v30 = vpop.eup %3245 }
 0x7af   :  { %v2003_v56 = vmul.f32 %v3937_v36, %v3246_v30  ;;  %v3177_v30 = vld [vmem:[#allocation13 + $0x40] sm:$0xff]  }
 0x7b1   :  { %v2004_v9 = vmul.f32 %v2003_v56, %v1976_v62  ;;  %v2012_v7 = vrot.slane %v2003_v56, %v2011_v63  ;;  %v3170_v62 = vld [vmem:[#allocation13 + $0x20] sm:$0xff]  }
 0x7b2   :  { %2881 = vmatpush3.bf16.msra.mxu1 %v3170_v62  ;;  %v3178_v56 = vld [vmem:[#allocation13] sm:$0xff]  }
 0x7b3   :  { %v2006_v8 = vrot.slane %v2004_v9, 7  ;;  %v2013_v57 = vmul.f32 %v2012_v7, %v3942_v4  ;;  %v2014_v31 = vmul.f32 %v2012_v7, %v3940_v53  ;;  %v2015_v35 = vmul.f32 %v2012_v7, %v3946_v60 }
 0x7b4   :  { %v2016_v37 = vmul.f32 %v2012_v7, %v3950_v50  ;;  %v2017_v41 = vmul.f32 %v2012_v7, %v3959_v24  ;;  %v2018_v43 = vmul.f32 %v2012_v7, %v3969_v40  ;;  %v2019_v48 = vmul.f32 %v2012_v7, %v3966_v15 }
 0x7b5   :  { %v2008_v14 = vsub.f32 %v3937_v36, %v2006_v8  ;;  %v2020_v49 = vmul.f32 %v2012_v7, %v3964_v22 }
 0x7b7   :  { %v2024_v21 = vrot.slane %v2008_v14, %v2023_v12 }
 0x7b9   :  { %v2025_v25 = vadd.f32 %v2024_v21, %v2013_v57  ;;  %v2026_v26 = vadd.f32 %v2024_v21, %v2014_v31  ;;  %v2027_v38 = vadd.f32 %v2024_v21, %v2015_v35  ;;  %v2028_v20 = vadd.f32 %v2024_v21, %v2016_v37 }
 0x7ba   :  { %v2029_v45 = vadd.f32 %v2024_v21, %v2017_v41  ;;  %v2030_v27 = vadd.f32 %v2024_v21, %v2018_v43  ;;  %v2031_v42 = vadd.f32 %v2024_v21, %v2019_v48  ;;  %v2032_v6 = vadd.f32 %v2024_v21, %v2020_v49 }
 0x7bb   :  { %v2033_v32 = vmax.f32 %v2025_v25, 0.0  ;;  %v2034_v34 = vmax.f32 %v2026_v26, 0.0  ;;  %v2035_v36 = vmax.f32 %v2027_v38, 0.0  ;;  %v2036_v0 = vmax.f32 %v2028_v20, 0.0 }
 0x7bc   :  { %v2037_v46 = vmax.f32 %v2029_v45, 0.0  ;;  %v2038_v47 = vmax.f32 %v2030_v27, 0.0  ;;  %v2039_v55 = vmax.f32 %v2031_v42, 0.0  ;;  %v2040_v3 = vmax.f32 %v2032_v6, 0.0 }
 0x7bd   :  { %v2041_v28 = vpack.c.bf16 %v2034_v34, %v2033_v32  ;;  %v2042_v44 = vpack.c.bf16 %v2036_v0, %v2035_v36 }
 0x7be   :  { %v2043_v59 = vpack.c.bf16 %v2038_v47, %v2037_v46  ;;  %v2044_v5 = vpack.c.bf16 %v2040_v3, %v2039_v55 }
 0x7bf   :  { %2174 = vmatmul.mubr.bf16.vlgmr.msra.gmra.mxu0 %v2041_v28 }
 0x7c0   :  { %2183 = vmatprep.mubr.bf16.mxu0 %v3443_v1 }
 0x7c7   :  { %2184 = vmatmul.mubr.bf16.gmra.mxu0 %v2042_v44 }
 0x7c8   :  { %2193 = vmatprep.mubr.bf16.mxu0 %v3443_v1 }
 0x7cf   :  { %2194 = vmatmul.mubr.bf16.gmra.mxu0 %v2043_v59 }
 0x7d0   :  { %2203 = vmatprep.mubr.bf16.mxu0 %v3443_v1  ;;  %v3171_v1 = vld [vmem:[#allocation13 + $0x58] sm:$0xff]  }
 0x7d1   :  { %2882 = vmatprep.subr.bf16.mxu1 %v3171_v1 }
 0x7d2   :  { %2883 = vmatpush3.bf16.msra.mxu1 %v3172_v16 }
 0x7d3   :  { %2884 = vmatprep.subr.bf16.mxu1 %v3173_v54 }
 0x7d6   :  { %2885 = vmatpush3.bf16.msra.mxu1 %v3174_v18 }
 0x7d7   :  { %2204 = vmatmul.mubr.bf16.gmra.mxu0 %v2044_v5  ;;  %2886 = vmatprep.subr.bf16.mxu1 %v3175_v19 }
 0x7da   :  { %2887 = vmatpush3.bf16.msra.mxu1 %v3176_v23 }
 0x7db   :  { %2888 = vmatprep.subr.bf16.mxu1 %v3177_v30 }
 0x7de   :  { %2889 = vmatpush3.bf16.msra.mxu1 %v3178_v56 }
 0x87f   :  { %v3999_v9 = vpop.f32.mrf.mxu0 }
 0x880   :  { %v2258_v34 = vmul.f32 %v3999_v9, %v3999_v9 }
 0x881   :  { %v4001_v8 = vpop.f32.mrf.mxu0 }
 0x882   :  { %v2259_v36 = vmul.f32 %v4001_v8, %v4001_v8 }
 0x883   :  { %v4003_v7 = vpop.f32.mrf.mxu0 }
 0x884   :  { %v2260_v25 = vmul.f32 %v4003_v7, %v4003_v7  ;;  %v2230_v20 = vadd.f32 %v4003_v7, %v3999_v9 }
 0x885   :  { %v4005_v14 = vpop.f32.mrf.mxu0 }
 0x886   :  { %v2261_v35 = vmul.f32 %v4005_v14, %v4005_v14  ;;  %v2274_v0 = vadd.f32 %v2260_v25, %v2258_v34  ;;  %v2243_v45 = vadd.f32 %v4005_v14, %v4001_v8 }
 0x887   :  { %v4007_v21 = vpop.f32.mrf.mxu0 }
 0x888   :  { %v2262_v37 = vmul.f32 %v4007_v21, %v4007_v21  ;;  %v2287_v27 = vadd.f32 %v2261_v35, %v2259_v36 }
 0x889   :  { %v4009_v57 = vpop.f32.mrf.mxu0 }
 0x88a   :  { %v2263_v41 = vmul.f32 %v4009_v57, %v4009_v57  ;;  %v2275_v46 = vadd.f32 %v2274_v0, %v2262_v37  ;;  %v2244_v49 = vadd.f32 %v2243_v45, %v4009_v57 }
 0x88b   :  { %v4011_v31 = vpop.f32.mrf.mxu0 }
 0x88c   :  { %v2220_v26 = vmul.f32 %v3528_v17, %v4011_v31  ;;  %v2288_v42 = vadd.f32 %v2287_v27, %v2263_v41 }
 0x88d   :  { %v4017_v32 = vpop.f32.mrf.mxu0 }
 0x88e   :  { %v2221_v28 = vmul.f32 %v3528_v17, %v4017_v32  ;;  %v2264_v43 = vmul.f32 %v2220_v26, %v4011_v31  ;;  %v2231_v17 = vadd.f32 %v2230_v20, %v4007_v21 }
 0x88f   :  { %v4027_v38 = vpop.f32.mrf.mxu0 }
 0x890   :  { %v2265_v47 = vmul.f32 %v2221_v28, %v4017_v32  ;;  %v2232_v59 = vadd.f32 %v2231_v17, %v2220_v26  ;;  %v2276_v6 = vadd.f32 %v2275_v46, %v2264_v43  ;;  %v2266_v55 = vmul.f32 %v4027_v38, %v4027_v38 }
 0x891   :  { %v4036_v44 = vpop.f32.mrf.mxu0  ;;  %v2245_v5 = vadd.f32 %v2244_v49, %v2221_v28 }
 0x892   :  { %v2289_v58 = vadd.f32 %v2288_v42, %v2265_v47  ;;  %v2267_v10 = vmul.f32 %v4036_v44, %v4036_v44  ;;  %v2233_v13 = vadd.f32 %v2232_v59, %v4027_v38  ;;  %v2277_v51 = vadd.f32 %v2276_v6, %v2266_v55 }
 0x893   :  { %v4042_v48 = vpop.f32.mrf.mxu0  ;;  %v2246_v16 = vadd.f32 %v2245_v5, %v4036_v44 }
 0x894   :  { %v2268_v61 = vmul.f32 %v4042_v48, %v4042_v48  ;;  %v2234_v54 = vadd.f32 %v2233_v13, %v4042_v48  ;;  %v2290_v18 = vadd.f32 %v2289_v58, %v2267_v10 }
 0x895   :  { %v4047_v3 = vpop.f32.mrf.mxu0 }
 0x896   :  { %v2269_v52 = vmul.f32 %v4047_v3, %v4047_v3  ;;  %v2278_v19 = vadd.f32 %v2277_v51, %v2268_v61  ;;  %v2247_v56 = vadd.f32 %v2246_v16, %v4047_v3 }
 0x897   :  { %v4053_v11 = vpop.f32.mrf.mxu0 }
 0x898   :  { %v2270_v62 = vmul.f32 %v4053_v11, %v4053_v11  ;;  %v2235_v25 = vadd.f32 %v2234_v54, %v4053_v11  ;;  %v2291_v34 = vadd.f32 %v2290_v18, %v2269_v52 }
 0x899   :  { %v4060_v1 = vpop.f32.mrf.mxu0 }
 0x89a   :  { %v2271_v23 = vmul.f32 %v4060_v1, %v4060_v1  ;;  %v2279_v35 = vadd.f32 %v2278_v19, %v2270_v62  ;;  %v2248_v28 = vadd.f32 %v2247_v56, %v4060_v1 }
 0x89b   :  { %v4066_v30 = vpop.f32.mrf.mxu0 }
 0x89c   :  { %v2228_v26 = vmul.f32 %v3550_v29, %v4066_v30  ;;  %v2292_v41 = vadd.f32 %v2291_v34, %v2271_v23 }
 0x89d   :  { %v4072_v37 = vpop.f32.mrf.mxu0 }
 0x89e   :  { %v2236_v20 = vadd.f32 %v2235_v25, %v2228_v26  ;;  %v2272_v36 = vmul.f32 %v2228_v26, %v4066_v30  ;;  %v2229_v0 = vmul.f32 %v3550_v29, %v4072_v37 }
 0x8a0   :  { %v2237_v43 = vrot.slane %v2236_v20, 4  ;;  %v2280_v45 = vadd.f32 %v2279_v35, %v2272_v36  ;;  %v2249_v17 = vadd.f32 %v2248_v28, %v2229_v0  ;;  %v2273_v27 = vmul.f32 %v2229_v0, %v4072_v37 }
 0x8a2   :  { %v2238_v46 = vadd.f32 %v2237_v43, %v2236_v20  ;;  %v2281_v47 = vrot.slane %v2280_v45, 4  ;;  %v2250_v49 = vrot.slane %v2249_v17, 4  ;;  %v2293_v59 = vadd.f32 %v2292_v41, %v2273_v27 }
 0x8a3   :  { %v3445_v27 = vmov 1983009808  }
 0x8a4   :  { %v2239_v42 = vrot.slane %v2238_v46, 2  ;;  %v2282_v6 = vadd.f32 %v2281_v47, %v2280_v45  ;;  %v2251_v55 = vadd.f32 %v2250_v49, %v2249_v17  ;;  %v2294_v5 = vrot.slane %v2293_v59, 4 }
 0x8a6   :  { %v2240_v58 = vadd.f32 %v2239_v42, %v2238_v46  ;;  %v2283_v10 = vrot.slane %v2282_v6, 2  ;;  %v2252_v61 = vrot.slane %v2251_v55, 2  ;;  %v2295_v13 = vadd.f32 %v2294_v5, %v2293_v59 }
 0x8a7   :  { %v2314_v46 = vunpack.c.l.s4 %v3445_v27 }
 0x8a8   :  { %v2241_v51 = vrot.slane %v2240_v58, 1  ;;  %v2284_v29 = vadd.f32 %v2283_v10, %v2282_v6  ;;  %v2253_v52 = vadd.f32 %v2252_v61, %v2251_v55  ;;  %v2296_v62 = vrot.slane %v2295_v13, 2  ;;  %v249_v55 = vld [vmem:[#allocation7] sm:$0xf] }
 0x8a9   :  { %v2315_v47 = vunpack.c.0.s8 %v2314_v46 }
 0x8aa   :  { %v2242_v16 = vadd.f32 %v2241_v51, %v2240_v58  ;;  %v2285_v54 = vrot.slane %v2284_v29, 1  ;;  %v2254_v18 = vrot.slane %v2253_v52, 1  ;;  %v2297_v19 = vadd.f32 %v2296_v62, %v2295_v13 }
 0x8ab   :  { %v2318_v59 = vsub.s32 %v2315_v47, %v3520_v2 }
 0x8ac   :  { %v2256_v23 = vmul.f32 0.016129032, %v2242_v16  ;;  %v2286_v56 = vadd.f32 %v2285_v54, %v2284_v29  ;;  %v2255_v25 = vadd.f32 %v2254_v18, %v2253_v52  ;;  %v2298_v26 = vrot.slane %v2297_v19, 1 }
 0x8ae   :  { %v2300_v34 = vmul.f32 0.016129032, %v2286_v56  ;;  %v2302_v35 = vmul.f32 %v2256_v23, %v2256_v23  ;;  %v2257_v28 = vmul.f32 0.016129032, %v2255_v25  ;;  %v2299_v20 = vadd.f32 %v2298_v26, %v2297_v19 }
 0x8b0   :  { %v2304_v36 = vsub.f32 %v2300_v34, %v2302_v35  ;;  %v2301_v0 = vmul.f32 0.016129032, %v2299_v20  ;;  %v2303_v41 = vmul.f32 %v2257_v28, %v2257_v28 }
 0x8b2   :  { %v2306_v43 = vadd.f32 1e-05, %v2304_v36  ;;  %v2305_v45 = vsub.f32 %v2301_v0, %v2303_v41 }
 0x8b4   :  { %v2307_v17 = vadd.f32 1e-05, %v2305_v45  ;;  %3247 = vrsqrt.f32 %v2306_v43 }
 0x8b6   :  { %3249 = vrsqrt.f32 %v2307_v17 }
 0x8c1   :  { %v3248_v49 = vpop.eup %3247 }
 0x8c3   :  { %v3250_v42 = vpop.eup %3249 }
 0x8c4   :  { %v2312_v6 = vcombine.low %v3248_v49, %v3250_v42 }
 0x8c6   :  { %v2319_v5 = vrot.slane %v2312_v6, %v2318_v59 }
 0x8c8   :  { %v2321_v58 = vmul.f32 %v2319_v5, %v249_v55 }
 0x8ca   :  { %v2326_v10 = vrot.slane %v2321_v58, %v3575_v33  ;;  %v2330_v61 = vrot.slane %v2321_v58, %v2011_v63 }
 0x8cc   :  { %v2333_v13 = vmul.f32 %v2326_v10, %v2256_v23  ;;  %v2334_v51 = vmul.f32 %v2330_v61, %v2257_v28  ;;  %v2351_v16 = vrot.slane %v2326_v10, %v3575_v33  ;;  %v2355_v54 = vrot.slane %v2330_v61, %v3575_v33 }
 0x8ce   :  { %v2337_v29 = vcombine.low %v2333_v13, %v2334_v51  ;;  %v2371_v25 = vmul.f32 %v2355_v54, %v4072_v37  ;;  %v2357_v26 = vmul.f32 %v2355_v54, %v4001_v8  ;;  %v2359_v63 = vmul.f32 %v2355_v54, %v4005_v14 }
 0x8cf   :  { %v2356_v23 = vmul.f32 %v2351_v16, %v3999_v9  ;;  %v2358_v33 = vmul.f32 %v2351_v16, %v4003_v7  ;;  %v2361_v28 = vmul.f32 %v2355_v54, %v4009_v57  ;;  %v2363_v20 = vmul.f32 %v2355_v54, %v4017_v32 }
 0x8d0   :  { %v2344_v52 = vrot.slane %v2337_v29, %v2318_v59  ;;  %v2360_v2 = vmul.f32 %v2351_v16, %v4007_v21  ;;  %v2365_v8 = vmul.f32 %v2355_v54, %v4036_v44  ;;  %v2367_v9 = vmul.f32 %v2355_v54, %v4047_v3 }
 0x8d1   :  { %v2369_v32 = vmul.f32 %v2355_v54, %v4060_v1  ;;  %v2370_v49 = vmul.f32 %v2351_v16, %v4066_v30  ;;  %v2364_v54 = vmul.f32 %v2351_v16, %v4027_v38 }
 0x8d2   :  { %v2345_v62 = vrot.slane %v2344_v52, 7 }
 0x8d4   :  { %v2347_v18 = vsub.f32 %v249_v55, %v2345_v62 }
 0x8d6   :  { %v2376_v19 = vrot.slane %v2347_v18, %v3579_v39  ;;  %v2380_v56 = vrot.slane %v2347_v18, %v2023_v12  ;;  %v2362_v12 = vmul.f32 %v2351_v16, %v4011_v31  ;;  %v2368_v31 = vmul.f32 %v2351_v16, %v4053_v11 }
 0x8d7   :  { %v2366_v18 = vmul.f32 %v2351_v16, %v4042_v48 }
 0x8d8   :  { %v2386_v34 = vrot.slane %v2376_v19, %v3579_v39  ;;  %v2390_v35 = vrot.slane %v2380_v56, %v3579_v39 }
 0x8da   :  { %v2392_v37 = vadd.f32 %v2390_v35, %v2357_v26  ;;  %v2394_v14 = vadd.f32 %v2390_v35, %v2359_v63  ;;  %v2391_v36 = vadd.f32 %v2386_v34, %v2356_v23  ;;  %v2406_v0 = vadd.f32 %v2390_v35, %v2371_v25 }
 0x8db   :  { %v2393_v41 = vadd.f32 %v2386_v34, %v2358_v33  ;;  %v2396_v39 = vadd.f32 %v2390_v35, %v2361_v28  ;;  %v2398_v43 = vadd.f32 %v2390_v35, %v2363_v20  ;;  %v2400_v46 = vadd.f32 %v2390_v35, %v2365_v8 }
 0x8dc   :  { %v2408_v7 = vmax.f32 %v2392_v37, 0.0  ;;  %v2410_v45 = vmax.f32 %v2394_v14, 0.0  ;;  %v2407_v57 = vmax.f32 %v2391_v36, 0.0  ;;  %v2402_v47 = vadd.f32 %v2390_v35, %v2367_v9 }
 0x8dd   :  { %v2409_v17 = vmax.f32 %v2393_v41, 0.0  ;;  %v2412_v21 = vmax.f32 %v2396_v39, 0.0  ;;  %v2414_v27 = vmax.f32 %v2398_v43, 0.0  ;;  %v2422_v3 = vmax.f32 %v2406_v0, 0.0 }
 0x8de   :  { %v2424_v44 = vpack.c.bf16 %v2410_v45, %v2408_v7  ;;  %v2395_v42 = vadd.f32 %v2386_v34, %v2360_v2  ;;  %v2397_v6 = vadd.f32 %v2386_v34, %v2362_v12  ;;  %v2416_v5 = vmax.f32 %v2400_v46, 0.0 }
 0x8df   :  { %v2423_v59 = vpack.c.bf16 %v2409_v17, %v2407_v57  ;;  %v2426_v55 = vpack.c.bf16 %v2414_v27, %v2412_v21  ;;  %v2418_v58 = vmax.f32 %v2402_v47, 0.0  ;;  %v2404_v10 = vadd.f32 %v2390_v35, %v2369_v32 }
 0x8e0   :  { %2591 = vmatprep.mubr.bf16.mxu1 %v2424_v44  ;;  %v2403_v1 = vadd.f32 %v2386_v34, %v2368_v31  ;;  %v2405_v61 = vadd.f32 %v2386_v34, %v2370_v49  ;;  %v2411_v51 = vmax.f32 %v2395_v42, 0.0  ;;  %v2413_v29 = vmax.f32 %v2397_v6, 0.0 }
 0x8e1   :  { %2592 = vmatmul.mubr.bf16.vlgmr.msra.gmra.mxu1 %v2423_v59  ;;  %v2428_v13 = vpack.c.bf16 %v2418_v58, %v2416_v5  ;;  %v2420_v11 = vmax.f32 %v2404_v10, 0.0  ;;  %v2399_v25 = vadd.f32 %v2386_v34, %v2364_v54  ;;  %v2401_v26 = vadd.f32 %v2386_v34, %v2366_v18 }
 0x8e2   :  { %2599 = vmatprep.mubr.bf16.mxu1 %v2426_v55  ;;  %v2419_v52 = vmax.f32 %v2403_v1, 0.0  ;;  %v2421_v62 = vmax.f32 %v2405_v61, 0.0  ;;  %v2425_v56 = vpack.c.bf16 %v2413_v29, %v2411_v51 }
 0x8e3   :  { %v2430_v30 = vpack.c.bf16 %v2422_v3, %v2420_v11  ;;  %v2415_v63 = vmax.f32 %v2399_v25, 0.0  ;;  %v2417_v23 = vmax.f32 %v2401_v26, 0.0 }
 0x8e4   :  { %v2429_v19 = vpack.c.bf16 %v2421_v62, %v2419_v52 }
 0x8e5   :  { %v2427_v35 = vpack.c.bf16 %v2417_v23, %v2415_v63 }
 0x8e9   :  { %2600 = vmatmul.mubr.bf16.gmra.mxu1 %v2425_v56 }
 0x8ea   :  { %2607 = vmatprep.mubr.bf16.mxu1 %v2428_v13 }
 0x8f1   :  { %2608 = vmatmul.mubr.bf16.gmra.mxu1 %v2427_v35 }
 0x8f2   :  { %2615 = vmatprep.mubr.bf16.mxu1 %v2430_v30 }
 0x8f9   :  { %2616 = vmatmul.mubr.bf16.gmra.mxu1 %v2429_v19 }
 0x9a1   :  { %v2890_v33 = vpop.f32.mrf.mxu1 }
 0x9a3   :  { %v2891_v28 = vpop.f32.mrf.mxu1 }
 0x9a4   :  { %v2892_v20 = vadd.f32 %v2891_v28, %v2890_v33 }
 0x9a5   :  { %v2893_v2 = vpop.f32.mrf.mxu1 }
 0x9a6   :  { %v2624_v38 = vadd.f32 %v2892_v20, %v3942_v4 }
 0x9a7   :  { %v2894_v12 = vpop.f32.mrf.mxu1 }
 0x9a8   :  { %2632 = vst [vmem:[#allocation14] sm:$0xff] %v2624_v38  ;;  %v2895_v48 = vadd.f32 %v2894_v12, %v2893_v2 }
 0x9a9   :  { %v2896_v16 = vpop.f32.mrf.mxu1 }
 0x9aa   :  { %v2625_v34 = vadd.f32 %v2895_v48, %v3940_v53 }
 0x9ab   :  { %v2897_v8 = vpop.f32.mrf.mxu1 }
 0x9ac   :  { %2633 = vst [vmem:[#allocation14 + $0x8] sm:$0xff] %v2625_v34  ;;  %v2898_v37 = vadd.f32 %v2897_v8, %v2896_v16 }
 0x9ad   :  { %v2899_v14 = vpop.f32.mrf.mxu1 }
 0x9ae   :  { %v2626_v36 = vadd.f32 %v2898_v37, %v3946_v60 }
 0x9af   :  { %v2900_v9 = vpop.f32.mrf.mxu1 }
 0x9b0   :  { %2634 = vst [vmem:[#allocation14 + $0x10] sm:$0xff] %v2626_v36  ;;  %v2901_v0 = vadd.f32 %v2900_v9, %v2899_v14 }
 0x9b1   :  { %v2902_v41 = vpop.f32.mrf.mxu1 }
 0x9b2   :  { %v2627_v39 = vadd.f32 %v2901_v0, %v3950_v50 }
 0x9b3   :  { %v2903_v43 = vpop.f32.mrf.mxu1 }
 0x9b4   :  { %2635 = vst [vmem:[#allocation14 + $0x18] sm:$0xff] %v2627_v39  ;;  %v2904_v4 = vadd.f32 %v2903_v43, %v2902_v41 }
 0x9b5   :  { %v2905_v7 = vpop.f32.mrf.mxu1 }
 0x9b6   :  { %v2628_v45 = vadd.f32 %v2904_v4, %v3959_v24 }
 0x9b7   :  { %v2906_v57 = vpop.f32.mrf.mxu1 }
 0x9b8   :  { %2636 = vst [vmem:[#allocation14 + $0x20] sm:$0xff] %v2628_v45  ;;  %v2907_v53 = vadd.f32 %v2906_v57, %v2905_v7 }
 0x9b9   :  { %v2908_v32 = vpop.f32.mrf.mxu1 }
 0x9ba   :  { %v2629_v17 = vadd.f32 %v2907_v53, %v3969_v40 }
 0x9bb   :  { %v2909_v21 = vpop.f32.mrf.mxu1 }
 0x9bc   :  { %2637 = vst [vmem:[#allocation14 + $0x28] sm:$0xff] %v2629_v17  ;;  %v2910_v60 = vadd.f32 %v2909_v21, %v2908_v32 }
 0x9bd   :  { %v2911_v27 = vpop.f32.mrf.mxu1 }
 0x9be   :  { %v2630_v31 = vadd.f32 %v2910_v60, %v3966_v15 }
 0x9bf   :  { %v2912_v44 = vpop.f32.mrf.mxu1 }
 0x9c0   :  { %2638 = vst [vmem:[#allocation14 + $0x30] sm:$0xff] %v2630_v31  ;;  %v2913_v50 = vadd.f32 %v2912_v44, %v2911_v27 }
 0x9c2   :  { %v2631_v46 = vadd.f32 %v2913_v50, %v3964_v22 }
 0x9c4   :  { %2639 = vst [vmem:[#allocation14 + $0x38] sm:$0xff] %v2631_v46 }
 0x9c5   :  { %3411 = shalt.err (!%p3408_p11)
}
 0x9c6   :  { %2651 = dma.vmem_to_hbm [thread:$0]  %s2646_s6, 1024, %s4127_s7, [#allocation4], %s3436_s17, %s3436_s17, %s3437_s18  }
 0x9c7   :  { %3428 = dma.done.wait [#allocation4], 1024  }
 0x9c8   :  { %3429 = vsyncadd [#allocation4], 4294966272 }
 0x9c9   :  { %2655 = vsyncpa [#allocation3], 1 }
 0x9ca   :  { %2656 = vsyncpa [#allocation6], 1 }
 0x9cb   :  { %2657 = vsyncpa [#allocation9], 1 }
 0x9cc   :  { %2658 = vsyncpa [#allocation12], 1 }
 0x9cd   :  { %2659 = vsyncpa [#allocation4], 1 }

</bundles_post_ra>
